<compile_context>
chip_gen: v7x
topology: tpu7x:2x2x1
jax: 0.10.0
libtpu: 0.0.40
codegen_flags: <defaults>
</compile_context>

<pallas_src>
import functools

import jax
import jax.numpy as jnp
import numpy as np
from jax.experimental import pallas as pl
from jax.experimental.pallas import tpu as pltpu


def _round_up(x, m):
    return ((x + m - 1) // m) * m


def byte_combine_kernel(x_ref, wtoe_ref, aux_ref, wlin_ref, blin_ref, out_ref,
                        *, byte_len, ld, output_dim, highway_layers):
    """Fused conv + max + relu + highway + projection for one row tile.

    x_ref    : (tile_n, byte_len*emb_dim) bf16    flattened byte embeddings
    wtoe_ref : (byte_len*emb_dim, byte_len*ld) bf16  block-Toeplitz conv weight
    aux_ref  : (>=byte_len+1, ld) f32   rows [0, byte_len): position validity
               mask (0 valid / -1e30 invalid); row byte_len: conv bias
    wlin_ref : (2*H+1, ld, ld) bf16     [Wx_0, Wg_0, ..., Wx_{H-1}, Wg_{H-1}, Wproj]
    blin_ref : (>=2*H+1, ld) f32        matching biases (gate bias init = 1)
    out_ref  : (tile_n, output_dim) f32
    """
    x = x_ref[...]                                          # bf16, lane-dense

    # ---- conv: every (filter, position) pair in a single MXU call ----------
    s_all = jnp.dot(x, wtoe_ref[...], preferred_element_type=jnp.float32)
    aux = aux_ref[...]

    acc = None
    for p in range(byte_len):                               # static; 128-lane slices
        s_p = s_all[:, p * ld:(p + 1) * ld] + aux[p:p + 1, :]
        acc = s_p if acc is None else jnp.maximum(acc, s_p)
    # Bias is position-invariant => adding after the max is exact; then relu.
    h = jnp.maximum(acc + aux[byte_len:byte_len + 1, :], 0.0)

    blin = blin_ref[...]

    # ---- Highway layers (split relu / gate matmuls; lane-clean operands) ---
    for l in range(highway_layers):
        hb = h.astype(jnp.bfloat16)
        proj_x = (jnp.dot(hb, wlin_ref[2 * l],
                          preferred_element_type=jnp.float32)
                  + blin[2 * l:2 * l + 1, :])
        gate_l = (jnp.dot(hb, wlin_ref[2 * l + 1],
                          preferred_element_type=jnp.float32)
                  + blin[2 * l + 1:2 * l + 2, :])
        proj_x = jnp.maximum(proj_x, 0.0)
        gate = jax.nn.sigmoid(gate_l)
        h = gate * h + (1.0 - gate) * proj_x

    # ---- final projection ---------------------------------------------------
    k = 2 * highway_layers
    res = (jnp.dot(h.astype(jnp.bfloat16), wlin_ref[k],
                   preferred_element_type=jnp.float32)
           + blin[k:k + 1, :])
    out_ref[...] = res[:, :output_dim].astype(out_ref.dtype)


def pack_params(params, *, filters, byte_len, emb_dim, output_dim,
                highway_layers):
    """Host-side packing of the module's weights into a few lane-dense slabs."""
    last_dim = sum(oc for _, oc in filters)
    max_w = max(w for w, _ in filters)
    ld = _round_up(last_dim, 128)
    assert output_dim <= ld, "output_dim > lane-padded last_dim not supported"
    # TODO(synk): generalise the packed linear slab for output_dim > ld.

    # Per-tap packed conv weight (max_w, emb_dim, ld), bias, per-column width.
    w_big = np.zeros((max_w, emb_dim, ld), np.float32)
    conv_bias = np.zeros((1, ld), np.float32)
    col_w = np.zeros((ld,), np.int32)
    off = 0
    for (w, oc), (Wc, bc) in zip(filters, params["convs"]):
        w_big[:w, :, off:off + oc] = np.asarray(Wc)         # (w, emb_dim, oc)
        conv_bias[:, off:off + oc] = np.asarray(bc)
        col_w[off:off + oc] = w
        off += oc

    # Block-Toeplitz weight: x_flat @ wtoe yields every (position, filter) sum.
    wtoe = np.zeros((byte_len * emb_dim, byte_len * ld), np.float32)
    for p in range(byte_len):
        n_taps = min(max_w, byte_len - p)
        wtoe[p * emb_dim:(p + n_taps) * emb_dim, p * ld:(p + 1) * ld] = \
            w_big[:n_taps].reshape(n_taps * emb_dim, ld)

    # Validity mask: position p is valid for a width-w filter iff p + w <= byte_len.
    pos = np.arange(byte_len)[:, None]
    invalid = (col_w[None, :] > 0) & (pos + col_w[None, :] > byte_len)
    mask = np.where(invalid, -1e30, 0.0).astype(np.float32)

    aux_rows = _round_up(byte_len + 1, 8)
    aux = np.zeros((aux_rows, ld), np.float32)
    aux[:byte_len] = mask
    aux[byte_len:byte_len + 1] = conv_bias

    # Linear slab: highway relu/gate halves (split, zero-padded) + projection.
    n_lin = 2 * highway_layers + 1
    wlin = np.zeros((n_lin, ld, ld), np.float32)
    blin = np.zeros((_round_up(n_lin, 8), ld), np.float32)
    for l, (Wh, bh) in enumerate(params["highway"]):
        Wh = np.asarray(Wh)
        bh = np.asarray(bh)
        wlin[2 * l, :last_dim, :last_dim] = Wh[:, :last_dim]       # relu branch
        wlin[2 * l + 1, :last_dim, :last_dim] = Wh[:, last_dim:]   # gate branch
        blin[2 * l, :last_dim] = bh[0, :last_dim]
        blin[2 * l + 1, :last_dim] = bh[0, last_dim:]
    Wp, bp = params["proj"]
    wlin[2 * highway_layers, :last_dim, :output_dim] = np.asarray(Wp)
    blin[2 * highway_layers, :output_dim] = np.asarray(bp)[0]

    return dict(
        wtoe=jnp.asarray(wtoe, jnp.bfloat16),
        aux=jnp.asarray(aux, jnp.float32),
        wlin=jnp.asarray(wlin, jnp.bfloat16),
        blin=jnp.asarray(blin, jnp.float32),
        ld=ld,
    )


def byte_combine_cnn(features, packed, *, byte_len, emb_dim, output_dim,
                     highway_layers=2, tile_n=512):
    B, T = features.shape[0], features.shape[1]
    assert features.shape[2] == byte_len and features.shape[3] == emb_dim
    N = B * T
    ld = packed["ld"]

    # Big row tiles (sweep 256-1024 on real workloads); clamp to a divisor of N.
    tile_n = min(tile_n, N)
    while N % tile_n:
        tile_n //= 2
    assert tile_n == N or tile_n % 8 == 0, "row tile must satisfy sublane tiling"

    # (B,T,L,C) -> (N, L*C): lane-dense LHS for the Toeplitz matmul.  This is
    # equivalent to the PyTorch transpose(2,3).view path because the packed
    # weights are stored channel-last.
    x = features.reshape(N, byte_len * emb_dim).astype(jnp.bfloat16)

    kernel = functools.partial(
        byte_combine_kernel, byte_len=byte_len, ld=ld,
        output_dim=output_dim, highway_layers=highway_layers)

    aux_rows = packed["aux"].shape[0]
    blin_rows = packed["blin"].shape[0]
    n_lin = 2 * highway_layers + 1

    out = pl.pallas_call(
        kernel,
        out_shape=jax.ShapeDtypeStruct((N, output_dim), jnp.float32),
        grid=(N // tile_n,),
        in_specs=[
            pl.BlockSpec((tile_n, byte_len * emb_dim), lambda i: (i, 0)),
            pl.BlockSpec((byte_len * emb_dim, byte_len * ld), lambda i: (0, 0)),
            pl.BlockSpec((aux_rows, ld), lambda i: (0, 0)),
            pl.BlockSpec((n_lin, ld, ld), lambda i: (0, 0, 0)),
            pl.BlockSpec((blin_rows, ld), lambda i: (0, 0)),
        ],
        out_specs=pl.BlockSpec((tile_n, output_dim), lambda i: (i, 0)),
        compiler_params=pltpu.CompilerParams(
            dimension_semantics=("parallel",)),
    )(x, packed["wtoe"], packed["aux"], packed["wlin"], packed["blin"])
    return out.reshape(B, T, output_dim)


def init_params(key, filters, emb_dim, output_dim, highway_layers=2):
    """Deterministic synthetic init matching the PyTorch module's shapes."""
    last_dim = sum(oc for _, oc in filters)
    n_keys = 2 * len(filters) + highway_layers + 2
    keys = iter(jax.random.split(key, n_keys))

    convs = []
    for w, oc in filters:
        # torch Conv1d weight is (oc, emb_dim, w); store transposed (w, emb_dim, oc)
        Wc = (jax.random.normal(next(keys), (w, emb_dim, oc), jnp.float32)
              / np.sqrt(w * emb_dim))
        bc = 0.01 * jax.random.normal(next(keys), (1, oc), jnp.float32)
        convs.append((Wc, bc))

    highway = []
    xavier_std = np.sqrt(2.0 / (last_dim + 2 * last_dim))
    for _ in range(highway_layers):
        Wh = xavier_std * jax.random.normal(next(keys), (last_dim, 2 * last_dim),
                                            jnp.float32)
        # Highway.reset_parameters: proj bias = 0, gate bias = 1
        bh = jnp.concatenate(
            [jnp.zeros((1, last_dim), jnp.float32),
             jnp.ones((1, last_dim), jnp.float32)], axis=-1)
        highway.append((Wh, bh))

    Wp = (jax.random.normal(next(keys), (last_dim, output_dim), jnp.float32)
          / np.sqrt(last_dim))
    bp = 0.01 * jax.random.normal(next(keys), (1, output_dim), jnp.float32)

    return {"convs": convs, "highway": highway, "proj": (Wp, bp)}


def byte_combine_cnn_ref(features, params, *, filters, output_dim):
    """Pure-JAX f32 reference mirroring the PyTorch forward."""
    B, T, L, C = features.shape
    last_dim = sum(oc for _, oc in filters)
    x = features.reshape(B * T, L, C)
    outs = []
    for (w, oc), (Wc, bc) in zip(filters, params["convs"]):
        pos = []
        for p in range(L - w + 1):
            pos.append(jnp.einsum('nkc,kco->no', x[:, p:p + w, :], Wc,
                                  preferred_element_type=jnp.float32))
        v = jnp.max(jnp.stack(pos, 0), axis=0) + bc
        outs.append(jax.nn.relu(v))
    h = jnp.concatenate(outs, axis=-1)
    for Wh, bh in params["highway"]:
        proj = h @ Wh + bh
        px = jax.nn.relu(proj[:, :last_dim])
        g = jax.nn.sigmoid(proj[:, last_dim:])
        h = g * h + (1.0 - g) * px
    Wp, bp = params["proj"]
    return (h @ Wp + bp).reshape(B, T, output_dim)


if __name__ == "__main__":
    # Small shapes; configs.byte_len := 8  ->  filter widths 1..7
    B, T, byte_len, emb_dim, output_dim = 2, 8, 8, 32, 64
    filters = [(1, 4), (2, 8), (3, 12)] + [(i, 4 * i) for i in range(4, byte_len)]
    highway_layers = 2

    key = jax.random.PRNGKey(0)
    k_feat, k_param = jax.random.split(key)
    features = jax.random.normal(k_feat, (B, T, byte_len, emb_dim), jnp.float32)
    params = init_params(k_param, filters, emb_dim, output_dim,
                         highway_layers=highway_layers)
    packed = pack_params(params, filters=filters, byte_len=byte_len,
                         emb_dim=emb_dim, output_dim=output_dim,
                         highway_layers=highway_layers)

    out = byte_combine_cnn(features, packed, byte_len=byte_len, emb_dim=emb_dim,
                           output_dim=output_dim, highway_layers=highway_layers,
                           tile_n=512)
    out = jax.block_until_ready(out)

    ref = byte_combine_cnn_ref(features, params, filters=filters,
                               output_dim=output_dim)
    assert out.shape == (B, T, output_dim)
    # Tolerance covers bf16 matmul operands (f32 accumulation) vs the f32 reference.
    np.testing.assert_allclose(np.asarray(out), np.asarray(ref),
                               rtol=5e-2, atol=5e-2)
    print("KERNEL_OK")
</pallas_src>

<mosaic_0001>
module attributes {stable_mosaic.version = 11 : i64} {
  func.func @byte_combine_kernel(%arg0: i32, %arg1: memref<16x256xbf16, #tpu.memory_space<vmem>>, %arg2: memref<256x1024xbf16, #tpu.memory_space<vmem>>, %arg3: memref<16x128xf32, #tpu.memory_space<vmem>>, %arg4: memref<5x128x128xbf16, #tpu.memory_space<vmem>>, %arg5: memref<8x128xf32, #tpu.memory_space<vmem>>, %arg6: memref<16x64xf32, #tpu.memory_space<vmem>>) attributes {dimension_semantics = [#tpu.dimension_semantics<parallel>], iteration_bounds = array<i64: 1>, scalar_prefetch = 0 : i64, scratch_operands = 0 : i64, tpu.core_type = #tpu.core_type<tc>, window_params = [{transform_indices = @transform_0, window_bounds = array<i64: 16, 256>}, {pipeline_mode = #tpu.pipeline_mode<synchronous>, transform_indices = @transform_1, window_bounds = array<i64: 256, 1024>}, {pipeline_mode = #tpu.pipeline_mode<synchronous>, transform_indices = @transform_2, window_bounds = array<i64: 16, 128>}, {pipeline_mode = #tpu.pipeline_mode<synchronous>, transform_indices = @transform_3, window_bounds = array<i64: 5, 128, 128>}, {pipeline_mode = #tpu.pipeline_mode<synchronous>, transform_indices = @transform_4, window_bounds = array<i64: 8, 128>}, {transform_indices = @transform_5, window_bounds = array<i64: 16, 64>}]} {
    %c0 = arith.constant 0 : index
    %c0_0 = arith.constant 0 : index
    %0 = vector.load %arg1[%c0, %c0_0] : memref<16x256xbf16, #tpu.memory_space<vmem>>, vector<16x256xbf16>
    %c0_1 = arith.constant 0 : index
    %c0_2 = arith.constant 0 : index
    %1 = vector.load %arg2[%c0_1, %c0_2] : memref<256x1024xbf16, #tpu.memory_space<vmem>>, vector<256x1024xbf16>
    %cst = arith.constant dense<0.000000e+00> : vector<16x1024xf32>
    %2 = tpu.matmul %0, %1, %cst {dimension_numbers = #tpu.dot_dimension_numbers<[1], [0], [0], [1], [0, 0, 1, 1], [], []>} : vector<16x256xbf16>, vector<256x1024xbf16>, vector<16x1024xf32> -> vector<16x1024xf32>
    %c0_3 = arith.constant 0 : index
    %c0_4 = arith.constant 0 : index
    %3 = vector.load %arg3[%c0_3, %c0_4] : memref<16x128xf32, #tpu.memory_space<vmem>>, vector<16x128xf32>
    %4 = vector.extract_strided_slice %2 {offsets = [0, 0], sizes = [16, 128], strides = [1, 1]} : vector<16x1024xf32> to vector<16x128xf32>
    %5 = vector.extract_strided_slice %3 {offsets = [0, 0], sizes = [1, 128], strides = [1, 1]} : vector<16x128xf32> to vector<1x128xf32>
    %6 = vector.broadcast %5 : vector<1x128xf32> to vector<16x128xf32>
    %7 = arith.addf %4, %6 : vector<16x128xf32>
    %8 = vector.extract_strided_slice %2 {offsets = [0, 128], sizes = [16, 128], strides = [1, 1]} : vector<16x1024xf32> to vector<16x128xf32>
    %9 = vector.extract_strided_slice %3 {offsets = [1, 0], sizes = [1, 128], strides = [1, 1]} : vector<16x128xf32> to vector<1x128xf32>
    %10 = vector.broadcast %9 : vector<1x128xf32> to vector<16x128xf32>
    %11 = arith.addf %8, %10 : vector<16x128xf32>
    %12 = arith.maximumf %7, %11 : vector<16x128xf32>
    %13 = vector.extract_strided_slice %2 {offsets = [0, 256], sizes = [16, 128], strides = [1, 1]} : vector<16x1024xf32> to vector<16x128xf32>
    %14 = vector.extract_strided_slice %3 {offsets = [2, 0], sizes = [1, 128], strides = [1, 1]} : vector<16x128xf32> to vector<1x128xf32>
    %15 = vector.broadcast %14 : vector<1x128xf32> to vector<16x128xf32>
    %16 = arith.addf %13, %15 : vector<16x128xf32>
    %17 = arith.maximumf %12, %16 : vector<16x128xf32>
    %18 = vector.extract_strided_slice %2 {offsets = [0, 384], sizes = [16, 128], strides = [1, 1]} : vector<16x1024xf32> to vector<16x128xf32>
    %19 = vector.extract_strided_slice %3 {offsets = [3, 0], sizes = [1, 128], strides = [1, 1]} : vector<16x128xf32> to vector<1x128xf32>
    %20 = vector.broadcast %19 : vector<1x128xf32> to vector<16x128xf32>
    %21 = arith.addf %18, %20 : vector<16x128xf32>
    %22 = arith.maximumf %17, %21 : vector<16x128xf32>
    %23 = vector.extract_strided_slice %2 {offsets = [0, 512], sizes = [16, 128], strides = [1, 1]} : vector<16x1024xf32> to vector<16x128xf32>
    %24 = vector.extract_strided_slice %3 {offsets = [4, 0], sizes = [1, 128], strides = [1, 1]} : vector<16x128xf32> to vector<1x128xf32>
    %25 = vector.broadcast %24 : vector<1x128xf32> to vector<16x128xf32>
    %26 = arith.addf %23, %25 : vector<16x128xf32>
    %27 = arith.maximumf %22, %26 : vector<16x128xf32>
    %28 = vector.extract_strided_slice %2 {offsets = [0, 640], sizes = [16, 128], strides = [1, 1]} : vector<16x1024xf32> to vector<16x128xf32>
    %29 = vector.extract_strided_slice %3 {offsets = [5, 0], sizes = [1, 128], strides = [1, 1]} : vector<16x128xf32> to vector<1x128xf32>
    %30 = vector.broadcast %29 : vector<1x128xf32> to vector<16x128xf32>
    %31 = arith.addf %28, %30 : vector<16x128xf32>
    %32 = arith.maximumf %27, %31 : vector<16x128xf32>
    %33 = vector.extract_strided_slice %2 {offsets = [0, 768], sizes = [16, 128], strides = [1, 1]} : vector<16x1024xf32> to vector<16x128xf32>
    %34 = vector.extract_strided_slice %3 {offsets = [6, 0], sizes = [1, 128], strides = [1, 1]} : vector<16x128xf32> to vector<1x128xf32>
    %35 = vector.broadcast %34 : vector<1x128xf32> to vector<16x128xf32>
    %36 = arith.addf %33, %35 : vector<16x128xf32>
    %37 = arith.maximumf %32, %36 : vector<16x128xf32>
    %38 = vector.extract_strided_slice %2 {offsets = [0, 896], sizes = [16, 128], strides = [1, 1]} : vector<16x1024xf32> to vector<16x128xf32>
    %39 = vector.extract_strided_slice %3 {offsets = [7, 0], sizes = [1, 128], strides = [1, 1]} : vector<16x128xf32> to vector<1x128xf32>
    %40 = vector.broadcast %39 : vector<1x128xf32> to vector<16x128xf32>
    %41 = arith.addf %38, %40 : vector<16x128xf32>
    %42 = arith.maximumf %37, %41 : vector<16x128xf32>
    %43 = vector.extract_strided_slice %3 {offsets = [8, 0], sizes = [1, 128], strides = [1, 1]} : vector<16x128xf32> to vector<1x128xf32>
    %44 = vector.broadcast %43 : vector<1x128xf32> to vector<16x128xf32>
    %45 = arith.addf %42, %44 : vector<16x128xf32>
    %cst_5 = arith.constant 0.000000e+00 : f32
    %46 = vector.broadcast %cst_5 : f32 to vector<16x128xf32>
    %47 = arith.maximumf %45, %46 : vector<16x128xf32>
    %c0_6 = arith.constant 0 : index
    %c0_7 = arith.constant 0 : index
    %48 = vector.load %arg5[%c0_6, %c0_7] : memref<8x128xf32, #tpu.memory_space<vmem>>, vector<8x128xf32>
    %49 = arith.truncf %47 : vector<16x128xf32> to vector<16x128xbf16>
    %c0_8 = arith.constant 0 : index
    %c0_9 = arith.constant 0 : index
    %c0_10 = arith.constant 0 : index
    %50 = vector.load %arg4[%c0_8, %c0_9, %c0_10] : memref<5x128x128xbf16, #tpu.memory_space<vmem>>, vector<1x128x128xbf16>
    %51 = vector.shape_cast %50 : vector<1x128x128xbf16> to vector<128x128xbf16>
    %cst_11 = arith.constant dense<0.000000e+00> : vector<16x128xf32>
    %52 = tpu.matmul %49, %51, %cst_11 {dimension_numbers = #tpu.dot_dimension_numbers<[1], [0], [0], [1], [0, 0, 1, 1], [], []>} : vector<16x128xbf16>, vector<128x128xbf16>, vector<16x128xf32> -> vector<16x128xf32>
    %53 = vector.extract_strided_slice %48 {offsets = [0, 0], sizes = [1, 128], strides = [1, 1]} : vector<8x128xf32> to vector<1x128xf32>
    %54 = vector.broadcast %53 : vector<1x128xf32> to vector<16x128xf32>
    %55 = arith.addf %52, %54 : vector<16x128xf32>
    %c1 = arith.constant 1 : index
    %c0_12 = arith.constant 0 : index
    %c0_13 = arith.constant 0 : index
    %56 = vector.load %arg4[%c1, %c0_12, %c0_13] : memref<5x128x128xbf16, #tpu.memory_space<vmem>>, vector<1x128x128xbf16>
    %57 = vector.shape_cast %56 : vector<1x128x128xbf16> to vector<128x128xbf16>
    %cst_14 = arith.constant dense<0.000000e+00> : vector<16x128xf32>
    %58 = tpu.matmul %49, %57, %cst_14 {dimension_numbers = #tpu.dot_dimension_numbers<[1], [0], [0], [1], [0, 0, 1, 1], [], []>} : vector<16x128xbf16>, vector<128x128xbf16>, vector<16x128xf32> -> vector<16x128xf32>
    %59 = vector.extract_strided_slice %48 {offsets = [1, 0], sizes = [1, 128], strides = [1, 1]} : vector<8x128xf32> to vector<1x128xf32>
    %60 = vector.broadcast %59 : vector<1x128xf32> to vector<16x128xf32>
    %61 = arith.addf %58, %60 : vector<16x128xf32>
    %cst_15 = arith.constant 0.000000e+00 : f32
    %62 = vector.broadcast %cst_15 : f32 to vector<16x128xf32>
    %63 = arith.maximumf %55, %62 : vector<16x128xf32>
    %64 = arith.negf %61 : vector<16x128xf32>
    %65 = math.exp %64 : vector<16x128xf32>
    %cst_16 = arith.constant 1.000000e+00 : f32
    %66 = vector.broadcast %cst_16 : f32 to vector<16x128xf32>
    %67 = arith.addf %66, %65 : vector<16x128xf32>
    %68 = arith.divf %66, %67 : vector<16x128xf32>
    %69 = arith.mulf %68, %47 : vector<16x128xf32>
    %cst_17 = arith.constant 1.000000e+00 : f32
    %70 = vector.broadcast %cst_17 : f32 to vector<16x128xf32>
    %71 = arith.subf %70, %68 : vector<16x128xf32>
    %72 = arith.mulf %71, %63 : vector<16x128xf32>
    %73 = arith.addf %69, %72 : vector<16x128xf32>
    %74 = arith.truncf %73 : vector<16x128xf32> to vector<16x128xbf16>
    %c2 = arith.constant 2 : index
    %c0_18 = arith.constant 0 : index
    %c0_19 = arith.constant 0 : index
    %75 = vector.load %arg4[%c2, %c0_18, %c0_19] : memref<5x128x128xbf16, #tpu.memory_space<vmem>>, vector<1x128x128xbf16>
    %76 = vector.shape_cast %75 : vector<1x128x128xbf16> to vector<128x128xbf16>
    %cst_20 = arith.constant dense<0.000000e+00> : vector<16x128xf32>
    %77 = tpu.matmul %74, %76, %cst_20 {dimension_numbers = #tpu.dot_dimension_numbers<[1], [0], [0], [1], [0, 0, 1, 1], [], []>} : vector<16x128xbf16>, vector<128x128xbf16>, vector<16x128xf32> -> vector<16x128xf32>
    %78 = vector.extract_strided_slice %48 {offsets = [2, 0], sizes = [1, 128], strides = [1, 1]} : vector<8x128xf32> to vector<1x128xf32>
    %79 = vector.broadcast %78 : vector<1x128xf32> to vector<16x128xf32>
    %80 = arith.addf %77, %79 : vector<16x128xf32>
    %c3 = arith.constant 3 : index
    %c0_21 = arith.constant 0 : index
    %c0_22 = arith.constant 0 : index
    %81 = vector.load %arg4[%c3, %c0_21, %c0_22] : memref<5x128x128xbf16, #tpu.memory_space<vmem>>, vector<1x128x128xbf16>
    %82 = vector.shape_cast %81 : vector<1x128x128xbf16> to vector<128x128xbf16>
    %cst_23 = arith.constant dense<0.000000e+00> : vector<16x128xf32>
    %83 = tpu.matmul %74, %82, %cst_23 {dimension_numbers = #tpu.dot_dimension_numbers<[1], [0], [0], [1], [0, 0, 1, 1], [], []>} : vector<16x128xbf16>, vector<128x128xbf16>, vector<16x128xf32> -> vector<16x128xf32>
    %84 = vector.extract_strided_slice %48 {offsets = [3, 0], sizes = [1, 128], strides = [1, 1]} : vector<8x128xf32> to vector<1x128xf32>
    %85 = vector.broadcast %84 : vector<1x128xf32> to vector<16x128xf32>
    %86 = arith.addf %83, %85 : vector<16x128xf32>
    %cst_24 = arith.constant 0.000000e+00 : f32
    %87 = vector.broadcast %cst_24 : f32 to vector<16x128xf32>
    %88 = arith.maximumf %80, %87 : vector<16x128xf32>
    %89 = arith.negf %86 : vector<16x128xf32>
    %90 = math.exp %89 : vector<16x128xf32>
    %cst_25 = arith.constant 1.000000e+00 : f32
    %91 = vector.broadcast %cst_25 : f32 to vector<16x128xf32>
    %92 = arith.addf %91, %90 : vector<16x128xf32>
    %93 = arith.divf %91, %92 : vector<16x128xf32>
    %94 = arith.mulf %93, %73 : vector<16x128xf32>
    %cst_26 = arith.constant 1.000000e+00 : f32
    %95 = vector.broadcast %cst_26 : f32 to vector<16x128xf32>
    %96 = arith.subf %95, %93 : vector<16x128xf32>
    %97 = arith.mulf %96, %88 : vector<16x128xf32>
    %98 = arith.addf %94, %97 : vector<16x128xf32>
    %99 = arith.truncf %98 : vector<16x128xf32> to vector<16x128xbf16>
    %c4 = arith.constant 4 : index
    %c0_27 = arith.constant 0 : index
    %c0_28 = arith.constant 0 : index
    %100 = vector.load %arg4[%c4, %c0_27, %c0_28] : memref<5x128x128xbf16, #tpu.memory_space<vmem>>, vector<1x128x128xbf16>
    %101 = vector.shape_cast %100 : vector<1x128x128xbf16> to vector<128x128xbf16>
    %cst_29 = arith.constant dense<0.000000e+00> : vector<16x128xf32>
    %102 = tpu.matmul %99, %101, %cst_29 {dimension_numbers = #tpu.dot_dimension_numbers<[1], [0], [0], [1], [0, 0, 1, 1], [], []>} : vector<16x128xbf16>, vector<128x128xbf16>, vector<16x128xf32> -> vector<16x128xf32>
    %103 = vector.extract_strided_slice %48 {offsets = [4, 0], sizes = [1, 128], strides = [1, 1]} : vector<8x128xf32> to vector<1x128xf32>
    %104 = vector.broadcast %103 : vector<1x128xf32> to vector<16x128xf32>
    %105 = arith.addf %102, %104 : vector<16x128xf32>
    %106 = vector.extract_strided_slice %105 {offsets = [0, 0], sizes = [16, 64], strides = [1, 1]} : vector<16x128xf32> to vector<16x64xf32>
    %c0_30 = arith.constant 0 : index
    %c0_31 = arith.constant 0 : index
    %107 = vector.load %arg6[%c0_30, %c0_31] : memref<16x64xf32, #tpu.memory_space<vmem>>, vector<16x64xf32>
    tpu.vector_store %arg6[%c0_30, %c0_31], %106 {strides = array<i32>} : memref<16x64xf32, #tpu.memory_space<vmem>>, vector<16x64xf32>,
    return
  }
  func.func @transform_0(%arg0: i32) -> (i32, i32) {
    %c0_i32 = arith.constant 0 : i32
    %c0_i32_0 = arith.constant 0 : i32
    return %arg0, %c0_i32 : i32, i32
  }
  func.func @transform_1(%arg0: i32) -> (i32, i32) {
    %c0_i32 = arith.constant 0 : i32
    %c0_i32_0 = arith.constant 0 : i32
    %c0_i32_1 = arith.constant 0 : i32
    return %c0_i32, %c0_i32_0 : i32, i32
  }
  func.func @transform_2(%arg0: i32) -> (i32, i32) {
    %c0_i32 = arith.constant 0 : i32
    %c0_i32_0 = arith.constant 0 : i32
    %c0_i32_1 = arith.constant 0 : i32
    return %c0_i32, %c0_i32_0 : i32, i32
  }
  func.func @transform_3(%arg0: i32) -> (i32, i32, i32) {
    %c0_i32 = arith.constant 0 : i32
    %c0_i32_0 = arith.constant 0 : i32
    %c0_i32_1 = arith.constant 0 : i32
    %c0_i32_2 = arith.constant 0 : i32
    return %c0_i32, %c0_i32_0, %c0_i32_1 : i32, i32, i32
  }
  func.func @transform_4(%arg0: i32) -> (i32, i32) {
    %c0_i32 = arith.constant 0 : i32
    %c0_i32_0 = arith.constant 0 : i32
    %c0_i32_1 = arith.constant 0 : i32
    return %c0_i32, %c0_i32_0 : i32, i32
  }
  func.func @transform_5(%arg0: i32) -> (i32, i32) {
    %c0_i32 = arith.constant 0 : i32
    %c0_i32_0 = arith.constant 0 : i32
    return %arg0, %c0_i32 : i32, i32
  }
}

</mosaic_0001>

<bundles_post_ra>
// kernel: tpu_custom_call.1
= control target key start
LH: loop header
LB: loop body
LE: loop exit
PB: predicated region body
PF: predicated region fallthrough
CT: control target
= control target key end

     0   :  { %10 = vsyncpa [#allocation3], 0  ;;  %s2465_s0 = inlined_call_operand.hbm [shape: bf16[16,256], index: 0, kind: input, shape index: {}]   ;;  %s2466_s1 = inlined_call_operand.hbm [shape: bf16[256,1024], index: 1, kind: input, shape index: {}]   ;;  %s2467_s2 = inlined_call_operand.hbm [shape: f32[16,128], index: 2, kind: input, shape index: {}]   ;;  %s2468_s3 = inlined_call_operand.hbm [shape: bf16[5,128,128], index: 3, kind: input, shape index: {}]   ;;  %s2469_s4 = inlined_call_operand.vmem [shape: f32[8,128], index: 4, kind: input, shape index: {}]   ;;  %s2470_s5 = inlined_call_operand.hbm [shape: f32[16,64], index: 5, kind: output, shape index: {}]  }
   0x1   :  { %11 = vsyncpa [#allocation6], 0 }
   0x2   :  { %12 = vsyncpa [#allocation9], 0 }
   0x3   :  { %13 = vsyncpa [#allocation4], 0  ;;  %s2229_s18 = smov [#allocation5]   ;;  %s2111_s22 = scalar_lea.hbm %s2466_s1, 16384 }
   0x4   :  { %s31_s19 = sshll.u32 %s2229_s18, 4  ;;  %p2112_p0 = scmp.ne.s32.totalorder %s2466_s1, %s2111_s22  ;;  %s32_s19 = int_to_ptr.vmem [resolvable:$true] %s31_s19 }
   0x5   :  { %p2115_p1 = scmp.lt.u32.totalorder %s2111_s22, %s2466_s1 }
   0x7   :  { %p2117_p2 = pnand %p2115_p1, %p2112_p0 }
   0x9   :  { %2120 = shalt.err (!%p2117_p2)
}
   0xa   :  { %s2121_s27 = scalar_lea.vmem %s32_s19, 16384  ;;  %p2126_p4 = scmp.lt.s32.totalorder %s32_s19, %s32_s19 }
   0xb   :  { %p2122_p3 = scmp.ne.s32.totalorder %s32_s19, %s2121_s27  ;;  %p2127_p5 = scmp.lt.s32.totalorder %s2121_s27, %s2121_s27 }
   0xd   :  { %p2128_p6 = por %p2127_p5, %p2126_p4 }
   0xf   :  { %p2129_p7 = pnand %p2128_p6, %p2122_p3 }
  0x11   :  { %2132 = shalt.err (!%p2129_p7)
}
  0x12   :  { %s2230_s28 = smov 512   ;;  %s2231_s29 = smov 32  }
  0x13   :  { %37 = dma.hbm_to_vmem [thread:$0]  %s2466_s1, 16384, %s32_s19, [#allocation6], %s2230_s28, %s2230_s28, %s2231_s29  }
  0x14   :  { %s2232_s7 = smov [#allocation2]   ;;  %s2133_s11 = scalar_lea.hbm %s2465_s0, 256 }
  0x15   :  { %s19_s8 = sshll.u32 %s2232_s7, 4  ;;  %p2134_p8 = scmp.ne.s32.totalorder %s2465_s0, %s2133_s11  ;;  %s20_s8 = int_to_ptr.vmem [resolvable:$true] %s19_s8 }
  0x16   :  { %p2137_p9 = scmp.lt.u32.totalorder %s2133_s11, %s2465_s0 }
  0x18   :  { %p2139_p10 = pnand %p2137_p9, %p2134_p8 }
  0x1a   :  { %2142 = shalt.err (!%p2139_p10)
}
  0x1b   :  { %s2143_s16 = scalar_lea.vmem %s20_s8, 256  ;;  %p2148_p12 = scmp.lt.s32.totalorder %s20_s8, %s20_s8 }
  0x1c   :  { %p2144_p11 = scmp.ne.s32.totalorder %s20_s8, %s2143_s16  ;;  %p2149_p13 = scmp.lt.s32.totalorder %s2143_s16, %s2143_s16 }
  0x1e   :  { %p2150_p0 = por %p2149_p13, %p2148_p12 }
  0x20   :  { %p2151_p1 = pnand %p2150_p0, %p2144_p11 }
  0x22   :  { %2154 = shalt.err (!%p2151_p1)
}
  0x23   :  { %s2233_s1 = smov 128   ;;  %s2234_s17 = smov 8  }
  0x24   :  { %25 = dma.hbm_to_vmem [thread:$0]  %s2465_s0, 256, %s20_s8, [#allocation3], %s2233_s1, %s2233_s1, %s2234_s17  }
  0x25   :  { %s2235_s20 = smov [#allocation7]   ;;  %s2236_s22 = smov [#allocation8]  }
  0x26   :  { %s43_s21 = sshll.u32 %s2235_s20, 4  ;;  %s55_s23 = sshll.u32 %s2236_s22, 4  ;;  %s44_s21 = int_to_ptr.vmem [resolvable:$true] %s43_s21  ;;  %s2299_s23 = int_to_ptr.vmem [resolvable:$true] %s55_s23 }
  0x27   :  { %s2155_s26 = scalar_lea.hbm %s2467_s2, 256 }
  0x28   :  { %p2156_p2 = scmp.ne.s32.totalorder %s2467_s2, %s2155_s26  ;;  %p2159_p3 = scmp.lt.u32.totalorder %s2155_s26, %s2467_s2 }
  0x2a   :  { %p2161_p4 = pnand %p2159_p3, %p2156_p2 }
  0x2c   :  { %2164 = shalt.err (!%p2161_p4)
}
  0x2d   :  { %s2165_s0 = scalar_lea.vmem %s44_s21, 256  ;;  %p2170_p6 = scmp.lt.s32.totalorder %s44_s21, %s44_s21 }
  0x2e   :  { %p2166_p5 = scmp.ne.s32.totalorder %s44_s21, %s2165_s0  ;;  %p2171_p7 = scmp.lt.s32.totalorder %s2165_s0, %s2165_s0 }
  0x30   :  { %p2172_p8 = por %p2171_p7, %p2170_p6 }
  0x32   :  { %p2173_p9 = pnand %p2172_p8, %p2166_p5 }
  0x34   :  { %2176 = shalt.err (!%p2173_p9)
}
  0x35   :  { %49 = dma.hbm_to_vmem [thread:$0]  %s2467_s2, 256, %s44_s21, [#allocation6], %s2233_s1, %s2233_s1, %s2234_s17  }
  0x36   :  { %s2177_s10 = scalar_lea.hbm %s2468_s3, 5120 }
  0x37   :  { %p2178_p10 = scmp.ne.s32.totalorder %s2468_s3, %s2177_s10  ;;  %p2181_p11 = scmp.lt.u32.totalorder %s2177_s10, %s2468_s3 }
  0x39   :  { %p2183_p12 = pnand %p2181_p11, %p2178_p10 }
  0x3b   :  { %2186 = shalt.err (!%p2183_p12)
}
  0x3c   :  { %s2187_s15 = scalar_lea.vmem %s2299_s23, 5120  ;;  %p2192_p0 = scmp.lt.s32.totalorder %s2299_s23, %s2299_s23 }
  0x3d   :  { %p2188_p13 = scmp.ne.s32.totalorder %s2299_s23, %s2187_s15  ;;  %p2193_p1 = scmp.lt.s32.totalorder %s2187_s15, %s2187_s15 }
  0x3f   :  { %p2194_p2 = por %p2193_p1, %p2192_p0 }
  0x41   :  { %p2195_p3 = pnand %p2194_p2, %p2188_p13 }
  0x43   :  { %2198 = shalt.err (!%p2195_p3)
}
  0x44   :  { %s2237_s2 = smov 64   ;;  %s2238_s16 = smov 4  }
  0x45   :  { %61 = dma.hbm_to_vmem [thread:$0]  %s2468_s3, 5120, %s2299_s23, [#allocation9], %s2237_s2, %s2237_s2, %s2238_s16  }
  0x46   :  { %2221 = dma.done.wait [#allocation3], 256  }
  0x47   :  { %2222 = vsyncadd [#allocation3], 4294967040 }
  0x48   :  { %2223 = dma.done.wait [#allocation6], 16640  }
  0x49   :  { %2224 = vsyncadd [#allocation6], 4294950656 }
  0x4a   :  { %2225 = dma.done.wait [#allocation9], 5120  }
  0x4b   :  { %2226 = vsyncadd [#allocation9], 4294962176  ;;  %v79_v0 = vld [vmem:[#allocation5] sm:$0xff]  ;;  %v80_v2 = vld [vmem:[#allocation5 + $0x8] sm:$0xff]  ;;  %vm2240_vm0 = vmmov 0   ;;  %vm1698_vm1 = vcmask 523264  }
  0x4c   :  { %v83_v1 = vld [vmem:[#allocation5 + $0x20] sm:$0xff]  ;;  %v84_v5 = vld [vmem:[#allocation5 + $0x28] sm:$0xff]  ;;  %v2333_v56 = vld [vmem:[#allocation2 + $0x4] ss:$8 sps:$4 sm:$0xff]  }
  0x4d   :  { %v1723_v3 = vcombine.high %v79_v0, %v83_v1  ;;  %v1722_v4 = vcombine.low %v79_v0, %v83_v1  ;;  %v87_v6 = vld [vmem:[#allocation5 + $0x40] sm:$0xff]  ;;  %v1725_v8 = vcombine.high %v80_v2, %v84_v5  ;;  %v1724_v9 = vcombine.low %v80_v2, %v84_v5  ;;  %v88_v11 = vld [vmem:[#allocation5 + $0x48] sm:$0xff]  ;;  %889 = vmatprep.mubr.bf16.mxu0 %v2333_v56 }
  0x4e   :  { %v91_v7 = vld [vmem:[#allocation5 + $0x60] sm:$0xff]  ;;  %v92_v12 = vld [vmem:[#allocation5 + $0x68] sm:$0xff]  ;;  %932 = vmatprep.mubr.bf16.mxu1 %v2333_v56 }
  0x4f   :  { %v1731_v10 = vcombine.high %v87_v6, %v91_v7  ;;  %v95_v13 = vld [vmem:[#allocation5 + $0x80] sm:$0xff]  ;;  %857 = vmatprep.subr.bf16.mxu0 %v1723_v3  ;;  %v1733_v14 = vcombine.high %v88_v11, %v92_v12  ;;  %v96_v16 = vld [vmem:[#allocation5 + $0x88] sm:$0xff]  ;;  %900 = vmatprep.subr.bf16.mxu1 %v1725_v8  ;;  %v1730_v18 = vcombine.low %v87_v6, %v91_v7 }
  0x50   :  { %v99_v15 = vld [vmem:[#allocation5 + $0xa0] sm:$0xff]  ;;  %v100_v17 = vld [vmem:[#allocation5 + $0xa8] sm:$0xff]  ;;  %858 = vmatpush1.bf16.msra.mxu0 %v1722_v4  ;;  %901 = vmatpush1.bf16.msra.mxu1 %v1724_v9  ;;  %v1732_v19 = vcombine.low %v88_v11, %v92_v12 }
  0x51   :  { %859 = vmatprep.subr.bf16.mxu0 %v1731_v10  ;;  %v1739_v20 = vcombine.high %v95_v13, %v99_v15  ;;  %902 = vmatprep.subr.bf16.mxu1 %v1733_v14  ;;  %v1741_v21 = vcombine.high %v96_v16, %v100_v17  ;;  %v103_v22 = vld [vmem:[#allocation5 + $0xc0] sm:$0xff]  ;;  %v104_v24 = vld [vmem:[#allocation5 + $0xc8] sm:$0xff]  ;;  %v1738_v26 = vcombine.low %v95_v13, %v99_v15 }
  0x52   :  { %v107_v23 = vld [vmem:[#allocation5 + $0xe0] sm:$0xff]  ;;  %v108_v25 = vld [vmem:[#allocation5 + $0xe8] sm:$0xff]  ;;  %v1740_v27 = vcombine.low %v96_v16, %v100_v17 }
  0x53   :  { %v1747_v28 = vcombine.high %v103_v22, %v107_v23  ;;  %v1749_v29 = vcombine.high %v104_v24, %v108_v25  ;;  %v111_v30 = vld [vmem:[#allocation5 + $0x100] sm:$0xff]  ;;  %v112_v32 = vld [vmem:[#allocation5 + $0x108] sm:$0xff]  ;;  %v1746_v34 = vcombine.low %v103_v22, %v107_v23  ;;  %v1748_v35 = vcombine.low %v104_v24, %v108_v25 }
  0x54   :  { %860 = vmatpush1.bf16.msra.mxu0 %v1730_v18  ;;  %903 = vmatpush1.bf16.msra.mxu1 %v1732_v19  ;;  %v115_v31 = vld [vmem:[#allocation5 + $0x120] sm:$0xff]  ;;  %v116_v33 = vld [vmem:[#allocation5 + $0x128] sm:$0xff] }
  0x55   :  { %861 = vmatprep.subr.bf16.mxu0 %v1739_v20  ;;  %904 = vmatprep.subr.bf16.mxu1 %v1741_v21  ;;  %v1755_v36 = vcombine.high %v111_v30, %v115_v31  ;;  %v1757_v37 = vcombine.high %v112_v32, %v116_v33  ;;  %v119_v38 = vld [vmem:[#allocation5 + $0x140] sm:$0xff]  ;;  %v120_v40 = vld [vmem:[#allocation5 + $0x148] sm:$0xff]  ;;  %v1754_v42 = vcombine.low %v111_v30, %v115_v31 }
  0x56   :  { %v123_v39 = vld [vmem:[#allocation5 + $0x160] sm:$0xff]  ;;  %v124_v41 = vld [vmem:[#allocation5 + $0x168] sm:$0xff]  ;;  %v1756_v43 = vcombine.low %v112_v32, %v116_v33 }
  0x57   :  { %v1763_v44 = vcombine.high %v119_v38, %v123_v39  ;;  %v1765_v45 = vcombine.high %v120_v40, %v124_v41  ;;  %v127_v46 = vld [vmem:[#allocation5 + $0x180] sm:$0xff]  ;;  %v128_v48 = vld [vmem:[#allocation5 + $0x188] sm:$0xff]  ;;  %v1762_v50 = vcombine.low %v119_v38, %v123_v39  ;;  %v1764_v51 = vcombine.low %v120_v40, %v124_v41 }
  0x58   :  { %862 = vmatpush1.bf16.msra.mxu0 %v1738_v26  ;;  %905 = vmatpush1.bf16.msra.mxu1 %v1740_v27  ;;  %v131_v47 = vld [vmem:[#allocation5 + $0x1a0] sm:$0xff]  ;;  %v132_v49 = vld [vmem:[#allocation5 + $0x1a8] sm:$0xff] }
  0x59   :  { %863 = vmatprep.subr.bf16.mxu0 %v1747_v28  ;;  %906 = vmatprep.subr.bf16.mxu1 %v1749_v29  ;;  %v1771_v52 = vcombine.high %v127_v46, %v131_v47  ;;  %v1773_v53 = vcombine.high %v128_v48, %v132_v49  ;;  %v135_v54 = vld [vmem:[#allocation5 + $0x1c0] sm:$0xff]  ;;  %v136_v57 = vld [vmem:[#allocation5 + $0x1c8] sm:$0xff]  ;;  %v1770_v59 = vcombine.low %v127_v46, %v131_v47 }
  0x5a   :  { %v139_v55 = vld [vmem:[#allocation5 + $0x1e0] sm:$0xff]  ;;  %v140_v58 = vld [vmem:[#allocation5 + $0x1e8] sm:$0xff]  ;;  %v1772_v60 = vcombine.low %v128_v48, %v132_v49 }
  0x5b   :  { %v1779_v61 = vcombine.high %v135_v54, %v139_v55  ;;  %v1781_v62 = vcombine.high %v136_v57, %v140_v58  ;;  %v143_v63 = vld [vmem:[#allocation5 + $0x200] sm:$0xff]  ;;  %v144_v1 = vld [vmem:[#allocation5 + $0x208] sm:$0xff]  ;;  %v1778_v3 = vcombine.low %v135_v54, %v139_v55  ;;  %v1780_v4 = vcombine.low %v136_v57, %v140_v58 }
  0x5c   :  { %864 = vmatpush1.bf16.msra.mxu0 %v1746_v34  ;;  %907 = vmatpush1.bf16.msra.mxu1 %v1748_v35  ;;  %v147_v0 = vld [vmem:[#allocation5 + $0x220] sm:$0xff]  ;;  %v148_v2 = vld [vmem:[#allocation5 + $0x228] sm:$0xff] }
  0x5d   :  { %865 = vmatprep.subr.bf16.mxu0 %v1755_v36  ;;  %908 = vmatprep.subr.bf16.mxu1 %v1757_v37  ;;  %v1787_v5 = vcombine.high %v143_v63, %v147_v0  ;;  %v1789_v6 = vcombine.high %v144_v1, %v148_v2  ;;  %v151_v7 = vld [vmem:[#allocation5 + $0x240] sm:$0xff]  ;;  %v152_v9 = vld [vmem:[#allocation5 + $0x248] sm:$0xff]  ;;  %v1786_v11 = vcombine.low %v143_v63, %v147_v0 }
  0x5e   :  { %v155_v8 = vld [vmem:[#allocation5 + $0x260] sm:$0xff]  ;;  %v156_v10 = vld [vmem:[#allocation5 + $0x268] sm:$0xff]  ;;  %v1788_v12 = vcombine.low %v144_v1, %v148_v2  ;;  %v82_v1 = vld [vmem:[#allocation5 + $0x18] sm:$0xff] }
  0x5f   :  { %v1795_v13 = vcombine.high %v151_v7, %v155_v8  ;;  %v1797_v14 = vcombine.high %v152_v9, %v156_v10  ;;  %v159_v15 = vld [vmem:[#allocation5 + $0x280] sm:$0xff]  ;;  %v160_v17 = vld [vmem:[#allocation5 + $0x288] sm:$0xff]  ;;  %v1794_v19 = vcombine.low %v151_v7, %v155_v8  ;;  %v1796_v20 = vcombine.low %v152_v9, %v156_v10  ;;  %v86_v2 = vld [vmem:[#allocation5 + $0x38] sm:$0xff] }
  0x60   :  { %866 = vmatpush1.bf16.msra.mxu0 %v1754_v42  ;;  %909 = vmatpush1.bf16.msra.mxu1 %v1756_v43  ;;  %v163_v16 = vld [vmem:[#allocation5 + $0x2a0] sm:$0xff]  ;;  %v164_v18 = vld [vmem:[#allocation5 + $0x2a8] sm:$0xff]  ;;  %v2337_v8 = vld [vmem:[#allocation2] ss:$8 sps:$4 sm:$0xff]  }
  0x61   :  { %867 = vmatprep.subr.bf16.mxu0 %v1763_v44  ;;  %910 = vmatprep.subr.bf16.mxu1 %v1765_v45  ;;  %v1803_v21 = vcombine.high %v159_v15, %v163_v16  ;;  %v1805_v22 = vcombine.high %v160_v17, %v164_v18  ;;  %v167_v23 = vld [vmem:[#allocation5 + $0x2c0] sm:$0xff]  ;;  %v168_v25 = vld [vmem:[#allocation5 + $0x2c8] sm:$0xff]  ;;  %v1802_v27 = vcombine.low %v159_v15, %v163_v16  ;;  %v90_v10 = vld [vmem:[#allocation5 + $0x58] sm:$0xff] }
  0x62   :  { %v171_v24 = vld [vmem:[#allocation5 + $0x2e0] sm:$0xff]  ;;  %v172_v26 = vld [vmem:[#allocation5 + $0x2e8] sm:$0xff]  ;;  %v1804_v28 = vcombine.low %v160_v17, %v164_v18  ;;  %v101_v15 = vld [vmem:[#allocation5 + $0xb0] sm:$0xff]  ;;  %v1728_v16 = vcombine.low %v82_v1, %v86_v2 }
  0x63   :  { %v1811_v29 = vcombine.high %v167_v23, %v171_v24  ;;  %v1813_v30 = vcombine.high %v168_v25, %v172_v26  ;;  %v175_v31 = vld [vmem:[#allocation5 + $0x300] sm:$0xff]  ;;  %v176_v33 = vld [vmem:[#allocation5 + $0x308] sm:$0xff]  ;;  %v1810_v35 = vcombine.low %v167_v23, %v171_v24  ;;  %v1812_v38 = vcombine.low %v168_v25, %v172_v26  ;;  %v98_v18 = vld [vmem:[#allocation5 + $0x98] sm:$0xff] }
  0x64   :  { %868 = vmatpush1.bf16.msra.mxu0 %v1762_v50  ;;  %911 = vmatpush1.bf16.msra.mxu1 %v1764_v51  ;;  %v179_v32 = vld [vmem:[#allocation5 + $0x320] sm:$0xff]  ;;  %v180_v34 = vld [vmem:[#allocation5 + $0x328] sm:$0xff]  ;;  %v109_v26 = vld [vmem:[#allocation5 + $0xf0] sm:$0xff] }
  0x65   :  { %869 = vmatprep.subr.bf16.mxu0 %v1771_v52  ;;  %912 = vmatprep.subr.bf16.mxu1 %v1773_v53  ;;  %v183_v36 = vld [vmem:[#allocation5 + $0x340] sm:$0xff]  ;;  %v1819_v39 = vcombine.high %v175_v31, %v179_v32  ;;  %v184_v40 = vld [vmem:[#allocation5 + $0x348] sm:$0xff]  ;;  %v1821_v42 = vcombine.high %v176_v33, %v180_v34  ;;  %v1818_v43 = vcombine.low %v175_v31, %v179_v32 }
  0x66   :  { %v187_v37 = vld [vmem:[#allocation5 + $0x360] sm:$0xff]  ;;  %v188_v41 = vld [vmem:[#allocation5 + $0x368] sm:$0xff]  ;;  %v1820_v46 = vcombine.low %v176_v33, %v180_v34  ;;  %v113_v33 = vld [vmem:[#allocation5 + $0x110] sm:$0xff] }
  0x67   :  { %v191_v44 = vld [vmem:[#allocation5 + $0x380] sm:$0xff]  ;;  %v1827_v47 = vcombine.high %v183_v36, %v187_v37  ;;  %v192_v48 = vld [vmem:[#allocation5 + $0x388] sm:$0xff]  ;;  %v1829_v50 = vcombine.high %v184_v40, %v188_v41  ;;  %v1826_v51 = vcombine.low %v183_v36, %v187_v37  ;;  %v1828_v54 = vcombine.low %v184_v40, %v188_v41  ;;  %v117_v34 = vld [vmem:[#allocation5 + $0x130] sm:$0xff] }
  0x68   :  { %870 = vmatpush1.bf16.msra.mxu0 %v1770_v59  ;;  %913 = vmatpush1.bf16.msra.mxu1 %v1772_v60  ;;  %v195_v45 = vld [vmem:[#allocation5 + $0x3a0] sm:$0xff]  ;;  %v196_v49 = vld [vmem:[#allocation5 + $0x3a8] sm:$0xff]  ;;  %v118_v36 = vld [vmem:[#allocation5 + $0x138] sm:$0xff] }
  0x69   :  { %871 = vmatprep.subr.bf16.mxu0 %v1779_v61  ;;  %914 = vmatprep.subr.bf16.mxu1 %v1781_v62  ;;  %v199_v52 = vld [vmem:[#allocation5 + $0x3c0] sm:$0xff]  ;;  %v1835_v55 = vcombine.high %v191_v44, %v195_v45  ;;  %v200_v57 = vld [vmem:[#allocation5 + $0x3c8] sm:$0xff]  ;;  %v1837_v59 = vcombine.high %v192_v48, %v196_v49  ;;  %v1834_v60 = vcombine.low %v191_v44, %v195_v45  ;;  %v81_v61 = vld [vmem:[#allocation5 + $0x10] sm:$0xff] }
  0x6a   :  { %v203_v53 = vld [vmem:[#allocation5 + $0x3e0] sm:$0xff]  ;;  %v204_v58 = vld [vmem:[#allocation5 + $0x3e8] sm:$0xff]  ;;  %v85_v62 = vld [vmem:[#allocation5 + $0x30] sm:$0xff]  ;;  %v1836_v63 = vcombine.low %v192_v48, %v196_v49  ;;  %v1758_v44 = vcombine.low %v113_v33, %v117_v34 }
  0x6b   :  { %v1843_v0 = vcombine.high %v199_v52, %v203_v53  ;;  %v1844_v7 = vcombine.low %v200_v57, %v204_v58  ;;  %v1727_v9 = vcombine.high %v81_v61, %v85_v62  ;;  %v121_v40 = vld [vmem:[#allocation5 + $0x150] sm:$0xff] }
  0x6c   :  { %872 = vmatpush1.bf16.msra.mxu0 %v1778_v3  ;;  %915 = vmatpush1.bf16.msra.mxu1 %v1780_v4  ;;  %v1845_v3 = vcombine.high %v200_v57, %v204_v58  ;;  %v1842_v4 = vcombine.low %v199_v52, %v203_v53  ;;  %v125_v41 = vld [vmem:[#allocation5 + $0x170] sm:$0xff] }
  0x6d   :  { %873 = vmatprep.subr.bf16.mxu0 %v1787_v5  ;;  %916 = vmatprep.subr.bf16.mxu1 %v1789_v6  ;;  %v89_v5 = vld [vmem:[#allocation5 + $0x50] sm:$0xff]  ;;  %v1766_v52 = vcombine.low %v121_v40, %v125_v41 }
  0x6e   :  { %v93_v6 = vld [vmem:[#allocation5 + $0x70] sm:$0xff] }
  0x6f   :  { %v1735_v17 = vcombine.high %v89_v5, %v93_v6  ;;  %v129_v48 = vld [vmem:[#allocation5 + $0x190] sm:$0xff] }
  0x70   :  { %874 = vmatpush1.bf16.msra.mxu0 %v1786_v11  ;;  %917 = vmatpush1.bf16.msra.mxu1 %v1788_v12  ;;  %v94_v11 = vld [vmem:[#allocation5 + $0x78] sm:$0xff]  ;;  %v1729_v12 = vcombine.high %v82_v1, %v86_v2  ;;  %v133_v49 = vld [vmem:[#allocation5 + $0x1b0] sm:$0xff] }
  0x71   :  { %875 = vmatprep.subr.bf16.mxu0 %v1795_v13  ;;  %918 = vmatprep.subr.bf16.mxu1 %v1797_v14  ;;  %v1726_v13 = vcombine.low %v81_v61, %v85_v62  ;;  %v97_v14 = vld [vmem:[#allocation5 + $0x90] sm:$0xff]  ;;  %v1736_v23 = vcombine.low %v90_v10, %v94_v11  ;;  %v1774_v61 = vcombine.low %v129_v48, %v133_v49 }
  0x72   :  { %v1743_v24 = vcombine.high %v97_v14, %v101_v15  ;;  %v137_v57 = vld [vmem:[#allocation5 + $0x1d0] sm:$0xff] }
  0x73   :  { %v141_v58 = vld [vmem:[#allocation5 + $0x1f0] sm:$0xff] }
  0x74   :  { %876 = vmatpush1.bf16.msra.mxu0 %v1794_v19  ;;  %919 = vmatpush1.bf16.msra.mxu1 %v1796_v20  ;;  %v102_v19 = vld [vmem:[#allocation5 + $0xb8] sm:$0xff]  ;;  %v1737_v20 = vcombine.high %v90_v10, %v94_v11  ;;  %v145_v1 = vld [vmem:[#allocation5 + $0x210] sm:$0xff] }
  0x75   :  { %877 = vmatprep.subr.bf16.mxu0 %v1803_v21  ;;  %920 = vmatprep.subr.bf16.mxu1 %v1805_v22  ;;  %v1734_v21 = vcombine.low %v89_v5, %v93_v6  ;;  %v105_v22 = vld [vmem:[#allocation5 + $0xd0] sm:$0xff]  ;;  %v1745_v25 = vcombine.high %v98_v18, %v102_v19  ;;  %v1782_v5 = vcombine.low %v137_v57, %v141_v58 }
  0x76   :  { %v1751_v31 = vcombine.high %v105_v22, %v109_v26  ;;  %v1750_v37 = vcombine.low %v105_v22, %v109_v26  ;;  %v149_v2 = vld [vmem:[#allocation5 + $0x230] sm:$0xff] }
  0x77   :  { %v153_v10 = vld [vmem:[#allocation5 + $0x250] sm:$0xff] }
  0x78   :  { %878 = vmatpush1.bf16.msra.mxu0 %v1802_v27  ;;  %921 = vmatpush1.bf16.msra.mxu1 %v1804_v28  ;;  %v106_v27 = vld [vmem:[#allocation5 + $0xd8] sm:$0xff]  ;;  %v157_v11 = vld [vmem:[#allocation5 + $0x270] sm:$0xff] }
  0x79   :  { %879 = vmatprep.subr.bf16.mxu0 %v1811_v29  ;;  %922 = vmatprep.subr.bf16.mxu1 %v1813_v30  ;;  %v110_v28 = vld [vmem:[#allocation5 + $0xf8] sm:$0xff]  ;;  %v1742_v29 = vcombine.low %v97_v14, %v101_v15  ;;  %v1744_v30 = vcombine.low %v98_v18, %v102_v19  ;;  %v1790_v14 = vcombine.low %v145_v1, %v149_v2  ;;  %v161_v18 = vld [vmem:[#allocation5 + $0x290] sm:$0xff] }
  0x7a   :  { %v1753_v32 = vcombine.high %v106_v27, %v110_v28  ;;  %v165_v19 = vld [vmem:[#allocation5 + $0x2b0] sm:$0xff]  ;;  %v1798_v22 = vcombine.low %v153_v10, %v157_v11 }
  0x7b   :  { %v169_v26 = vld [vmem:[#allocation5 + $0x2d0] sm:$0xff] }
  0x7c   :  { %880 = vmatpush1.bf16.msra.mxu0 %v1810_v35  ;;  %923 = vmatpush1.bf16.msra.mxu1 %v1812_v38  ;;  %v114_v35 = vld [vmem:[#allocation5 + $0x118] sm:$0xff]  ;;  %v1752_v38 = vcombine.low %v106_v27, %v110_v28  ;;  %v173_v27 = vld [vmem:[#allocation5 + $0x2f0] sm:$0xff] }
  0x7d   :  { %881 = vmatprep.subr.bf16.mxu0 %v1819_v39  ;;  %924 = vmatprep.subr.bf16.mxu1 %v1821_v42  ;;  %v1759_v39 = vcombine.high %v113_v33, %v117_v34  ;;  %v122_v42 = vld [vmem:[#allocation5 + $0x158] sm:$0xff]  ;;  %v1760_v45 = vcombine.low %v114_v35, %v118_v36  ;;  %v177_v34 = vld [vmem:[#allocation5 + $0x310] sm:$0xff] }
  0x7e   :  { %v170_v28 = vld [vmem:[#allocation5 + $0x2d8] sm:$0xff] }
  0x80   :  { %882 = vmatpush1.bf16.msra.mxu0 %v1818_v43  ;;  %925 = vmatpush1.bf16.msra.mxu1 %v1820_v46  ;;  %v126_v43 = vld [vmem:[#allocation5 + $0x178] sm:$0xff]  ;;  %v1767_v46 = vcombine.high %v121_v40, %v125_v41  ;;  %v185_v41 = vld [vmem:[#allocation5 + $0x350] sm:$0xff] }
  0x81   :  { %883 = vmatprep.subr.bf16.mxu0 %v1827_v47  ;;  %926 = vmatprep.subr.bf16.mxu1 %v1829_v50  ;;  %v1769_v47 = vcombine.high %v122_v42, %v126_v43  ;;  %v130_v50 = vld [vmem:[#allocation5 + $0x198] sm:$0xff]  ;;  %v1768_v53 = vcombine.low %v122_v42, %v126_v43  ;;  %v189_v42 = vld [vmem:[#allocation5 + $0x370] sm:$0xff] }
  0x82   :  { %v186_v43 = vld [vmem:[#allocation5 + $0x358] sm:$0xff] }
  0x84   :  { %884 = vmatpush1.bf16.msra.mxu0 %v1826_v51  ;;  %927 = vmatpush1.bf16.msra.mxu1 %v1828_v54  ;;  %v134_v51 = vld [vmem:[#allocation5 + $0x1b8] sm:$0xff]  ;;  %v1775_v54 = vcombine.high %v129_v48, %v133_v49  ;;  %v193_v49 = vld [vmem:[#allocation5 + $0x390] sm:$0xff] }
  0x85   :  { %885 = vmatprep.subr.bf16.mxu0 %v1835_v55  ;;  %928 = vmatprep.subr.bf16.mxu1 %v1837_v59  ;;  %v1777_v55 = vcombine.high %v130_v50, %v134_v51  ;;  %v138_v59 = vld [vmem:[#allocation5 + $0x1d8] sm:$0xff]  ;;  %v1776_v62 = vcombine.low %v130_v50, %v134_v51  ;;  %v197_v50 = vld [vmem:[#allocation5 + $0x3b0] sm:$0xff] }
  0x86   :  { %v194_v51 = vld [vmem:[#allocation5 + $0x398] sm:$0xff] }
  0x88   :  { %886 = vmatpush1.bf16.msra.mxu0 %v1834_v60  ;;  %929 = vmatpush1.bf16.msra.mxu1 %v1836_v63  ;;  %v142_v60 = vld [vmem:[#allocation5 + $0x1f8] sm:$0xff]  ;;  %v1783_v63 = vcombine.high %v137_v57, %v141_v58  ;;  %v201_v58 = vld [vmem:[#allocation5 + $0x3d0] sm:$0xff] }
  0x89   :  { %887 = vmatprep.subr.bf16.mxu0 %v1843_v0  ;;  %930 = vmatprep.subr.bf16.mxu1 %v1845_v3  ;;  %v1785_v0 = vcombine.high %v138_v59, %v142_v60  ;;  %v146_v3 = vld [vmem:[#allocation5 + $0x218] sm:$0xff]  ;;  %v1784_v6 = vcombine.low %v138_v59, %v142_v60  ;;  %v205_v59 = vld [vmem:[#allocation5 + $0x3f0] sm:$0xff] }
  0x8a   :  { %v202_v60 = vld [vmem:[#allocation5 + $0x3d8] sm:$0xff] }
  0x8c   :  { %888 = vmatpush1.bf16.msra.mxu0 %v1842_v4  ;;  %931 = vmatpush1.bf16.msra.mxu1 %v1844_v7  ;;  %v150_v4 = vld [vmem:[#allocation5 + $0x238] sm:$0xff]  ;;  %v1791_v7 = vcombine.high %v145_v1, %v149_v2  ;;  %v1846_v2 = vcombine.low %v201_v58, %v205_v59 }
  0x8d   :  { %943 = vmatprep.subr.bf16.mxu0 %v1727_v9  ;;  %986 = vmatprep.subr.bf16.mxu1 %v1729_v12  ;;  %v1793_v9 = vcombine.high %v146_v3, %v150_v4  ;;  %v154_v12 = vld [vmem:[#allocation5 + $0x258] sm:$0xff]  ;;  %v1792_v15 = vcombine.low %v146_v3, %v150_v4  ;;  %v2055_v4 = vld [vmem:[#allocation8] sm:$0xff]  }
  0x8f   :  { %890 = vmatmul.mubr.bf16.vlgmr.msra.gmra.mrb[0].mxu0 %v2337_v8  ;;  %933 = vmatmul.mubr.bf16.vlgmr.msra.gmra.mrb[0].mxu1 %v2337_v8 }
  0x90   :  { %944 = vmatpush1.bf16.msra.mxu0 %v1726_v13  ;;  %987 = vmatpush1.bf16.msra.mxu1 %v1728_v16  ;;  %v158_v13 = vld [vmem:[#allocation5 + $0x278] sm:$0xff]  ;;  %v1799_v16 = vcombine.high %v153_v10, %v157_v11  ;;  %v2059_v10 = vld [vmem:[#allocation8 + $0x10] sm:$0xff]  }
  0x91   :  { %945 = vmatprep.subr.bf16.mxu0 %v1735_v17  ;;  %988 = vmatprep.subr.bf16.mxu1 %v1737_v20  ;;  %v1801_v17 = vcombine.high %v154_v12, %v158_v13  ;;  %v162_v20 = vld [vmem:[#allocation5 + $0x298] sm:$0xff]  ;;  %v2060_v11 = vld [vmem:[#allocation8 + $0x50] sm:$0xff]  }
  0x92   :  { %975 = vmatprep.mubr.bf16.mxu0 %v2333_v56  ;;  %1018 = vmatprep.mubr.bf16.mxu1 %v2333_v56  ;;  %v1761_v56 = vcombine.high %v114_v35, %v118_v36  ;;  %v181_v35 = vld [vmem:[#allocation5 + $0x330] sm:$0xff]  ;;  %v178_v36 = vld [vmem:[#allocation5 + $0x318] sm:$0xff] }
  0x94   :  { %946 = vmatpush1.bf16.msra.mxu0 %v1734_v21  ;;  %989 = vmatpush1.bf16.msra.mxu1 %v1736_v23  ;;  %v166_v21 = vld [vmem:[#allocation5 + $0x2b8] sm:$0xff]  ;;  %v1800_v23 = vcombine.low %v154_v12, %v158_v13  ;;  %v2062_v12 = vld [vmem:[#allocation8 + $0x58] sm:$0xff]   ;;  %v2063_v13 = vld [vmem:[#allocation8 + $0x20] sm:$0xff]  }
  0x95   :  { %947 = vmatprep.subr.bf16.mxu0 %v1743_v24  ;;  %990 = vmatprep.subr.bf16.mxu1 %v1745_v25  ;;  %v1807_v24 = vcombine.high %v161_v18, %v165_v19  ;;  %v1809_v25 = vcombine.high %v162_v20, %v166_v21 }
  0x98   :  { %948 = vmatpush1.bf16.msra.mxu0 %v1742_v29  ;;  %991 = vmatpush1.bf16.msra.mxu1 %v1744_v30  ;;  %v174_v29 = vld [vmem:[#allocation5 + $0x2f8] sm:$0xff]  ;;  %v1806_v30 = vcombine.low %v161_v18, %v165_v19  ;;  %v2068_v18 = vld [vmem:[#allocation8 + $0x70] sm:$0xff]   ;;  %v2069_v19 = vld [vmem:[#allocation8 + $0x38] sm:$0xff]  }
  0x99   :  { %949 = vmatprep.subr.bf16.mxu0 %v1751_v31  ;;  %992 = vmatprep.subr.bf16.mxu1 %v1753_v32  ;;  %v1808_v31 = vcombine.low %v162_v20, %v166_v21  ;;  %v1815_v32 = vcombine.high %v169_v26, %v173_v27  ;;  %v1817_v33 = vcombine.high %v170_v28, %v174_v29  ;;  %v2070_v20 = vld [vmem:[#allocation8 + $0x78] sm:$0xff]   ;;  %v1031_v21 = vlaneseq }
  0x9c   :  { %950 = vmatpush1.bf16.msra.mxu0 %v1750_v37  ;;  %993 = vmatpush1.bf16.msra.mxu1 %v1752_v38  ;;  %v182_v37 = vld [vmem:[#allocation5 + $0x338] sm:$0xff]  ;;  %v1814_v38 = vcombine.low %v169_v26, %v173_v27 }
  0x9d   :  { %951 = vmatprep.subr.bf16.mxu0 %v1759_v39  ;;  %994 = vmatprep.subr.bf16.mxu1 %v1761_v56  ;;  %v1816_v39 = vcombine.low %v170_v28, %v174_v29  ;;  %v1823_v56 = vcombine.high %v177_v34, %v181_v35  ;;  %v1825_v40 = vcombine.high %v178_v36, %v182_v37 }
  0xa0   :  { %952 = vmatpush1.bf16.msra.mxu0 %v1758_v44  ;;  %995 = vmatpush1.bf16.msra.mxu1 %v1760_v45  ;;  %v190_v44 = vld [vmem:[#allocation5 + $0x378] sm:$0xff]  ;;  %v1822_v45 = vcombine.low %v177_v34, %v181_v35 }
  0xa1   :  { %953 = vmatprep.subr.bf16.mxu0 %v1767_v46  ;;  %996 = vmatprep.subr.bf16.mxu1 %v1769_v47  ;;  %v1824_v46 = vcombine.low %v178_v36, %v182_v37  ;;  %v1831_v47 = vcombine.high %v185_v41, %v189_v42  ;;  %v1833_v48 = vcombine.high %v186_v43, %v190_v44 }
  0xa4   :  { %954 = vmatpush1.bf16.msra.mxu0 %v1766_v52  ;;  %997 = vmatpush1.bf16.msra.mxu1 %v1768_v53  ;;  %v198_v52 = vld [vmem:[#allocation5 + $0x3b8] sm:$0xff]  ;;  %v1830_v53 = vcombine.low %v185_v41, %v189_v42 }
  0xa5   :  { %955 = vmatprep.subr.bf16.mxu0 %v1775_v54  ;;  %998 = vmatprep.subr.bf16.mxu1 %v1777_v55  ;;  %v1832_v54 = vcombine.low %v186_v43, %v190_v44  ;;  %v1839_v55 = vcombine.high %v193_v49, %v197_v50  ;;  %v1841_v57 = vcombine.high %v194_v51, %v198_v52 }
  0xa8   :  { %956 = vmatpush1.bf16.msra.mxu0 %v1774_v61  ;;  %999 = vmatpush1.bf16.msra.mxu1 %v1776_v62  ;;  %v206_v61 = vld [vmem:[#allocation5 + $0x3f8] sm:$0xff]  ;;  %v1838_v62 = vcombine.low %v193_v49, %v197_v50 }
  0xa9   :  { %957 = vmatprep.subr.bf16.mxu0 %v1783_v63  ;;  %1000 = vmatprep.subr.bf16.mxu1 %v1785_v0  ;;  %v1840_v63 = vcombine.low %v194_v51, %v198_v52  ;;  %v1847_v0 = vcombine.high %v201_v58, %v205_v59  ;;  %v1849_v1 = vcombine.high %v202_v60, %v206_v61 }
  0xaa   :  { %v1848_v3 = vcombine.low %v202_v60, %v206_v61 }
  0xac   :  { %958 = vmatpush1.bf16.msra.mxu0 %v1782_v5  ;;  %1001 = vmatpush1.bf16.msra.mxu1 %v1784_v6  ;;  %v2056_v5 = vld [vmem:[#allocation8 + $0x40] sm:$0xff]   ;;  %v2239_v6 = vmov 0.0  }
  0xad   :  { %959 = vmatprep.subr.bf16.mxu0 %v1791_v7  ;;  %1002 = vmatprep.subr.bf16.mxu1 %v1793_v9  ;;  %v2057_v7 = vld [vmem:[#allocation8 + $0x8] sm:$0xff]  }
  0xae   :  { %v2058_v9 = vld [vmem:[#allocation8 + $0x48] sm:$0xff]  }
  0xb0   :  { %960 = vmatpush1.bf16.msra.mxu0 %v1790_v14  ;;  %1003 = vmatpush1.bf16.msra.mxu1 %v1792_v15  ;;  %v2064_v14 = vld [vmem:[#allocation8 + $0x60] sm:$0xff]   ;;  %v2065_v15 = vld [vmem:[#allocation8 + $0x28] sm:$0xff]  }
  0xb1   :  { %961 = vmatprep.subr.bf16.mxu0 %v1799_v16  ;;  %1004 = vmatprep.subr.bf16.mxu1 %v1801_v17  ;;  %v2066_v16 = vld [vmem:[#allocation8 + $0x68] sm:$0xff]   ;;  %v2067_v17 = vld [vmem:[#allocation8 + $0x30] sm:$0xff]  }
  0xb4   :  { %962 = vmatpush1.bf16.msra.mxu0 %v1798_v22  ;;  %1005 = vmatpush1.bf16.msra.mxu1 %v1800_v23  ;;  %v2367_v22 = vshrl.u32 %v1031_v21, 7 }
  0xb5   :  { %963 = vmatprep.subr.bf16.mxu0 %v1807_v24  ;;  %1006 = vmatprep.subr.bf16.mxu1 %v1809_v25  ;;  %v1029_v24 = vld [vmem:[#allocation7] sm:$0xff] }
  0xb6   :  { %v2370_v23 = vsub.s32 0, %v2367_v22  ;;  %v1039_v25 = vsub.s32 1, %v2367_v22  ;;  %v1047_v26 = vsub.s32 2, %v2367_v22  ;;  %v1055_v27 = vsub.s32 3, %v2367_v22 }
  0xb7   :  { %v1087_v60 = vsub.s32 7, %v2367_v22 }
  0xb8   :  { %964 = vmatpush1.bf16.msra.mxu0 %v1806_v30  ;;  %1007 = vmatpush1.bf16.msra.mxu1 %v1808_v31  ;;  %v1034_v28 = vrot.slane %v1029_v24, %v2370_v23  ;;  %v1040_v29 = vrot.slane %v1029_v24, %v1039_v25  ;;  %v1048_v30 = vrot.slane %v1029_v24, %v1047_v26 }
  0xb9   :  { %965 = vmatprep.subr.bf16.mxu0 %v1815_v32  ;;  %1008 = vmatprep.subr.bf16.mxu1 %v1817_v33  ;;  %v1056_v32 = vrot.slane %v1029_v24, %v1055_v27 }
  0xbc   :  { %966 = vmatpush1.bf16.msra.mxu0 %v1814_v38  ;;  %1009 = vmatpush1.bf16.msra.mxu1 %v1816_v39 }
  0xbd   :  { %967 = vmatprep.subr.bf16.mxu0 %v1823_v56  ;;  %1010 = vmatprep.subr.bf16.mxu1 %v1825_v40 }
  0xc0   :  { %968 = vmatpush1.bf16.msra.mxu0 %v1822_v45  ;;  %1011 = vmatpush1.bf16.msra.mxu1 %v1824_v46 }
  0xc1   :  { %969 = vmatprep.subr.bf16.mxu0 %v1831_v47  ;;  %1012 = vmatprep.subr.bf16.mxu1 %v1833_v48 }
  0xc4   :  { %970 = vmatpush1.bf16.msra.mxu0 %v1830_v53  ;;  %1013 = vmatpush1.bf16.msra.mxu1 %v1832_v54  ;;  %v1063_v53 = vsub.s32 4, %v2367_v22  ;;  %v1071_v54 = vsub.s32 5, %v2367_v22 }
  0xc5   :  { %971 = vmatprep.subr.bf16.mxu0 %v1839_v55  ;;  %1014 = vmatprep.subr.bf16.mxu1 %v1841_v57  ;;  %v1079_v55 = vsub.s32 6, %v2367_v22 }
  0xc6   :  { %v1064_v57 = vrot.slane %v1029_v24, %v1063_v53  ;;  %v1072_v58 = vrot.slane %v1029_v24, %v1071_v54 }
  0xc7   :  { %v1080_v59 = vrot.slane %v1029_v24, %v1079_v55 }
  0xc8   :  { %972 = vmatpush1.bf16.msra.mxu0 %v1838_v62  ;;  %1015 = vmatpush1.bf16.msra.mxu1 %v1840_v63 }
  0xc9   :  { %973 = vmatprep.subr.bf16.mxu0 %v1847_v0  ;;  %1016 = vmatprep.subr.bf16.mxu1 %v1849_v1 }
  0xcc   :  { %974 = vmatpush1.bf16.msra.mxu0 %v1846_v2  ;;  %1017 = vmatpush1.bf16.msra.mxu1 %v1848_v3 }
  0xcd   :  { %1939 = vmatprep.subr.bf16.mxu0 %v2239_v6  ;;  %1959 = vmatprep.subr.bf16.mxu1 %v2239_v6 }
  0xcf   :  { %976 = vmatmul.mubr.bf16.vlgmr.msra.gmra.mrb[4].mxu0 %v2337_v8  ;;  %1019 = vmatmul.mubr.bf16.vlgmr.msra.gmra.mrb[4].mxu1 %v2337_v8  ;;  %v2061_v8 = vld [vmem:[#allocation8 + $0x18] sm:$0xff]  }
  0xd0   :  { %1940 = vmatpush3.bf16.msra.mxu0 %v2055_v4  ;;  %1960 = vmatpush3.bf16.msra.mxu1 %v2056_v5 }
  0xd1   :  { %1941 = vmatprep.subr.bf16.mxu0 %v2239_v6  ;;  %1961 = vmatprep.subr.bf16.mxu1 %v2239_v6 }
  0xd2   :  { %1955 = vmatprep.mubr.msk.bf16.mxu0 %vm2240_vm0, %v2239_v6  ;;  %1975 = vmatprep.mubr.msk.bf16.mxu1 %vm2240_vm0, %v2239_v6 }
  0xd4   :  { %1942 = vmatpush3.bf16.msra.mxu0 %v2057_v7  ;;  %1962 = vmatpush3.bf16.msra.mxu1 %v2058_v9  ;;  %v1030_v9 = vld [vmem:[#allocation7 + $0x8] sm:$0xff] }
  0xd5   :  { %1943 = vmatprep.subr.bf16.mxu0 %v2239_v6  ;;  %1963 = vmatprep.subr.bf16.mxu1 %v2239_v6 }
  0xd8   :  { %1944 = vmatpush3.bf16.msra.mxu0 %v2059_v10  ;;  %1964 = vmatpush3.bf16.msra.mxu1 %v2060_v11  ;;  %v1088_v10 = vrot.slane %v1029_v24, %v1087_v60 }
  0xd9   :  { %1945 = vmatprep.subr.bf16.mxu0 %v2239_v6  ;;  %1965 = vmatprep.subr.bf16.mxu1 %v2239_v6 }
  0xdc   :  { %1946 = vmatpush3.bf16.msra.mxu0 %v2061_v8  ;;  %1966 = vmatpush3.bf16.msra.mxu1 %v2062_v12 }
  0xdd   :  { %1947 = vmatprep.subr.bf16.mxu0 %v2239_v6  ;;  %1967 = vmatprep.subr.bf16.mxu1 %v2239_v6 }
  0xe0   :  { %1948 = vmatpush3.bf16.msra.mxu0 %v2063_v13  ;;  %1968 = vmatpush3.bf16.msra.mxu1 %v2064_v14 }
  0xe1   :  { %1949 = vmatprep.subr.bf16.mxu0 %v2239_v6  ;;  %1969 = vmatprep.subr.bf16.mxu1 %v2239_v6 }
  0xe4   :  { %1950 = vmatpush3.bf16.msra.mxu0 %v2065_v15  ;;  %1970 = vmatpush3.bf16.msra.mxu1 %v2066_v16  ;;  %v1096_v16 = vrot.slane %v1030_v9, %v2370_v23 }
  0xe5   :  { %1951 = vmatprep.subr.bf16.mxu0 %v2239_v6  ;;  %1971 = vmatprep.subr.bf16.mxu1 %v2239_v6 }
  0xe8   :  { %1952 = vmatpush3.bf16.msra.mxu0 %v2067_v17  ;;  %1972 = vmatpush3.bf16.msra.mxu1 %v2068_v18 }
  0xe9   :  { %1953 = vmatprep.subr.bf16.mxu0 %v2239_v6  ;;  %1973 = vmatprep.subr.bf16.mxu1 %v2239_v6 }
  0xec   :  { %1954 = vmatpush3.bf16.msra.mxu0 %v2069_v19  ;;  %1974 = vmatpush3.bf16.msra.mxu1 %v2070_v20 }
  0xed   :  { %1979 = vmatprep.subr.bf16.mxu0 %v2239_v6  ;;  %1999 = vmatprep.subr.bf16.mxu1 %v2239_v6 }
 0x162   :  { %v891_v31 = vpop.f32.mrb[0].mxu0  ;;  %v934_v35 = vpop.f32.mrb[0].mxu1 }
 0x163   :  { %v1035_v33 = vadd.f32 %v1034_v28, %v891_v31  ;;  %v893_v34 = vpop.f32.mrb[1].mxu0  ;;  %v1049_v38 = vadd.f32 %v1048_v30, %v934_v35  ;;  %v936_v39 = vpop.f32.mrb[1].mxu1  ;;  %v2071_v35 = vld [vmem:[#allocation8 + $0x80] sm:$0xff]  }
 0x164   :  { %v1041_v36 = vadd.f32 %v1040_v29, %v893_v34  ;;  %v895_v37 = vpop.f32.mrb[2].mxu0  ;;  %v938_v41 = vpop.f32.mrb[2].mxu1  ;;  %v1057_v44 = vadd.f32 %v1056_v32, %v936_v39  ;;  %v2075_v39 = vld [vmem:[#allocation8 + $0x90] sm:$0xff]  }
 0x165   :  { %v1036_v56 = vadd.f32 %v1034_v28, %v895_v37  ;;  %v897_v40 = vpop.f32.mrb[3].mxu0  ;;  %v1050_v45 = vadd.f32 %v1048_v30, %v938_v41  ;;  %v940_v46 = vpop.f32.mrb[3].mxu1  ;;  %v2073_v37 = vld [vmem:[#allocation8 + $0x88] sm:$0xff]   ;;  %v2078_v41 = vld [vmem:[#allocation8 + $0xd8] sm:$0xff]  }
 0x166   :  { %v1043_v42 = vmax.f32 %v1035_v33, %v1041_v36  ;;  %v1042_v43 = vadd.f32 %v1040_v29, %v897_v40  ;;  %v1058_v51 = vadd.f32 %v1056_v32, %v940_v46  ;;  %v2072_v36 = vld [vmem:[#allocation8 + $0xc0] sm:$0xff]   ;;  %v2077_v40 = vld [vmem:[#allocation8 + $0x98] sm:$0xff]   ;;  %v2083_v46 = vld [vmem:[#allocation8 + $0xb0] sm:$0xff]  }
 0x168   :  { %v1051_v47 = vmax.f32 %v1043_v42, %v1049_v38  ;;  %v1044_v48 = vmax.f32 %v1036_v56, %v1042_v43  ;;  %v2074_v38 = vld [vmem:[#allocation8 + $0xc8] sm:$0xff]   ;;  %v2076_v56 = vld [vmem:[#allocation8 + $0xd0] sm:$0xff]   ;;  %v2079_v42 = vld [vmem:[#allocation8 + $0xa0] sm:$0xff]  }
 0x169   :  { %v2080_v43 = vld [vmem:[#allocation8 + $0xe0] sm:$0xff]  }
 0x16a   :  { %v1059_v49 = vmax.f32 %v1051_v47, %v1057_v44  ;;  %v1052_v50 = vmax.f32 %v1044_v48, %v1050_v45  ;;  %v2081_v44 = vld [vmem:[#allocation8 + $0xa8] sm:$0xff]   ;;  %v2084_v47 = vld [vmem:[#allocation8 + $0xf0] sm:$0xff]   ;;  %v2085_v48 = vld [vmem:[#allocation8 + $0xb8] sm:$0xff]  }
 0x16b   :  { %v2082_v45 = vld [vmem:[#allocation8 + $0xe8] sm:$0xff]  }
 0x16c   :  { %v1060_v52 = vmax.f32 %v1052_v50, %v1058_v51  ;;  %v2421_v50 = vld [vmem:[%s2469_s4] sm:$0xff]  ;;  %s2241_s4 = smov [#allocation10]  }
 0x16d   :  { %v1232_v51 = vrot.slane %v2421_v50, %v1039_v25  ;;  %v1122_v25 = vrot.slane %v2421_v50, %v2370_v23  ;;  %v2087_v23 = vld [vmem:[#allocation8 + $0x100] sm:$0xff]   ;;  %s1706_s21 = sshll.u32 %s2241_s4, 4  ;;  %s1707_s21 = int_to_ptr.vmem [resolvable:$true] %s1706_s21 }
 0x16e   :  { %s2199_s22 = scalar_lea.vmem %s1707_s21, 256  ;;  %p2204_p5 = scmp.lt.s32.totalorder %s1707_s21, %s1707_s21 }
 0x16f   :  { %p2200_p4 = scmp.ne.s32.totalorder %s1707_s21, %s2199_s22  ;;  %p2205_p6 = scmp.lt.s32.totalorder %s2199_s22, %s2199_s22 }
 0x171   :  { %p2206_p7 = por %p2205_p6, %p2204_p5 }
 0x173   :  { %p2207_p8 = pnand %p2206_p7, %p2200_p4 }
 0x1a2   :  { %v977_v61 = vpop.f32.mrb[4].mxu0  ;;  %v1020_v0 = vpop.f32.mrb[4].mxu1 }
 0x1a3   :  { %v1065_v62 = vadd.f32 %v1064_v57, %v977_v61  ;;  %v979_v63 = vpop.f32.mrb[5].mxu0  ;;  %v1022_v3 = vpop.f32.mrb[5].mxu1  ;;  %v1081_v5 = vadd.f32 %v1080_v59, %v1020_v0 }
 0x1a4   :  { %v1073_v1 = vadd.f32 %v1072_v58, %v979_v63  ;;  %v981_v2 = vpop.f32.mrb[6].mxu0  ;;  %v1024_v8 = vpop.f32.mrb[6].mxu1  ;;  %v1089_v18 = vadd.f32 %v1088_v10, %v1022_v3 }
 0x1a5   :  { %v1067_v4 = vmax.f32 %v1059_v49, %v1065_v62  ;;  %v1066_v7 = vadd.f32 %v1064_v57, %v981_v2  ;;  %v983_v11 = vpop.f32.mrb[7].mxu0  ;;  %v1026_v13 = vpop.f32.mrb[7].mxu1  ;;  %v1082_v20 = vadd.f32 %v1080_v59, %v1024_v8  ;;  %v2086_v49 = vld [vmem:[#allocation8 + $0xf8] sm:$0xff]  }
 0x1a6   :  { %v1074_v12 = vadd.f32 %v1072_v58, %v983_v11  ;;  %v1090_v29 = vadd.f32 %v1088_v10, %v1026_v13 }
 0x1a7   :  { %v1075_v14 = vmax.f32 %v1067_v4, %v1073_v1  ;;  %v1068_v15 = vmax.f32 %v1060_v52, %v1066_v7 }
 0x1a9   :  { %v1083_v17 = vmax.f32 %v1075_v14, %v1081_v5  ;;  %v1076_v19 = vmax.f32 %v1068_v15, %v1074_v12 }
 0x1ab   :  { %v1091_v21 = vmax.f32 %v1083_v17, %v1089_v18  ;;  %v1084_v28 = vmax.f32 %v1076_v19, %v1082_v20 }
 0x1ad   :  { %v2389_v30 = vadd.f32 %v1096_v16, %v1091_v21  ;;  %v1092_v31 = vmax.f32 %v1084_v28, %v1090_v29  ;;  %v2088_v28 = vld [vmem:[#allocation8 + $0x108] sm:$0xff]   ;;  %v2089_v29 = vld [vmem:[#allocation8 + $0x110] sm:$0xff]  }
 0x1af   :  { %v2391_v32 = vadd.f32 %v1096_v16, %v1092_v31  ;;  %v1099_v24 = vmax.f32 %v2389_v30, 0.0  ;;  %v2090_v30 = vld [vmem:[#allocation8 + $0x118] sm:$0xff]   ;;  %v2091_v31 = vld [vmem:[#allocation8 + $0x120] sm:$0xff]  }
 0x1b1   :  { %v1100_v33 = vmax.f32 %v2391_v32, 0.0  ;;  %v2092_v32 = vld [vmem:[#allocation8 + $0x128] sm:$0xff]  }
 0x1b3   :  { %v1102_v34 = vpack.c.bf16 %v1100_v33, %v1099_v24 }
 0x1b5   :  { %1956 = vmatmul.mubr.bf16.vlgmr.msra.gmra.mrb[8].mxu0 %v1102_v34  ;;  %1976 = vmatmul.mubr.bf16.vlgmr.msra.gmra.mrb[8].mxu1 %v1102_v34  ;;  %v1475_v34 = vrot.slane %v2421_v50, %v1055_v27  ;;  %v1365_v27 = vrot.slane %v2421_v50, %v1047_v26  ;;  %v1608_v26 = vrot.slane %v2421_v50, %v1063_v53 }
 0x1b6   :  { %1995 = vmatprep.mubr.msk.bf16.mxu0 %vm2240_vm0, %v2239_v6  ;;  %2015 = vmatprep.mubr.msk.bf16.mxu1 %vm2240_vm0, %v2239_v6 }
 0x1b7   :  { %1980 = vmatpush3.bf16.msra.mxu0 %v2071_v35  ;;  %2000 = vmatpush3.bf16.msra.mxu1 %v2072_v36 }
 0x1b8   :  { %1981 = vmatprep.subr.bf16.mxu0 %v2239_v6  ;;  %2001 = vmatprep.subr.bf16.mxu1 %v2239_v6 }
 0x1bb   :  { %1982 = vmatpush3.bf16.msra.mxu0 %v2073_v37  ;;  %2002 = vmatpush3.bf16.msra.mxu1 %v2074_v38 }
 0x1bc   :  { %1983 = vmatprep.subr.bf16.mxu0 %v2239_v6  ;;  %2003 = vmatprep.subr.bf16.mxu1 %v2239_v6 }
 0x1bf   :  { %1984 = vmatpush3.bf16.msra.mxu0 %v2075_v39  ;;  %2004 = vmatpush3.bf16.msra.mxu1 %v2076_v56 }
 0x1c0   :  { %1985 = vmatprep.subr.bf16.mxu0 %v2239_v6  ;;  %2005 = vmatprep.subr.bf16.mxu1 %v2239_v6 }
 0x1c3   :  { %1986 = vmatpush3.bf16.msra.mxu0 %v2077_v40  ;;  %2006 = vmatpush3.bf16.msra.mxu1 %v2078_v41 }
 0x1c4   :  { %1987 = vmatprep.subr.bf16.mxu0 %v2239_v6  ;;  %2007 = vmatprep.subr.bf16.mxu1 %v2239_v6 }
 0x1c7   :  { %1988 = vmatpush3.bf16.msra.mxu0 %v2079_v42  ;;  %2008 = vmatpush3.bf16.msra.mxu1 %v2080_v43 }
 0x1c8   :  { %1989 = vmatprep.subr.bf16.mxu0 %v2239_v6  ;;  %2009 = vmatprep.subr.bf16.mxu1 %v2239_v6 }
 0x1cb   :  { %1990 = vmatpush3.bf16.msra.mxu0 %v2081_v44  ;;  %2010 = vmatpush3.bf16.msra.mxu1 %v2082_v45 }
 0x1cc   :  { %1991 = vmatprep.subr.bf16.mxu0 %v2239_v6  ;;  %2011 = vmatprep.subr.bf16.mxu1 %v2239_v6 }
 0x1cf   :  { %1992 = vmatpush3.bf16.msra.mxu0 %v2083_v46  ;;  %2012 = vmatpush3.bf16.msra.mxu1 %v2084_v47 }
 0x1d0   :  { %1993 = vmatprep.subr.bf16.mxu0 %v2239_v6  ;;  %2013 = vmatprep.subr.bf16.mxu1 %v2239_v6 }
 0x1d3   :  { %1994 = vmatpush3.bf16.msra.mxu0 %v2085_v48  ;;  %2014 = vmatpush3.bf16.msra.mxu1 %v2086_v49 }
 0x1d4   :  { %2019 = vmatprep.subr.bf16.mxu0 %v2239_v6 }
 0x288   :  { %v1205_v52 = vpop.f32.mrb[8].mxu0  ;;  %v1315_v54 = vpop.f32.mrb[8].mxu1 }
 0x289   :  { %v1316_v55 = vadd.f32 %v1315_v54, %v1232_v51  ;;  %v1957_v57 = vpop.f32.mrb[9].mxu0  ;;  %v1977_v58 = vpop.f32.mrb[9].mxu1  ;;  %v1206_v7 = vadd.f32 %v1205_v52, %v1122_v25 }
 0x28a   :  { %v1208_v59 = vpop.f32.mrb[10].mxu0  ;;  %v1318_v60 = vpop.f32.mrb[10].mxu1 }
 0x28b   :  { %v1866_v61 = vmul.f32 -1.442695, %v1316_v55  ;;  %v1319_v62 = vadd.f32 %v1318_v60, %v1232_v51  ;;  %v1958_v63 = vpop.f32.mrb[11].mxu0  ;;  %v1978_v0 = vpop.f32.mrb[11].mxu1  ;;  %v1209_v9 = vadd.f32 %v1208_v59, %v1122_v25  ;;  %v1322_v11 = vmax.f32 %v1206_v7, 0.0 }
 0x28d   :  { %2095 = vpow2.f32 %v1866_v61  ;;  %v1867_v1 = vmul.f32 -1.442695, %v1319_v62  ;;  %v1323_v13 = vmax.f32 %v1209_v9, 0.0 }
 0x28f   :  { %2097 = vpow2.f32 %v1867_v1 }
 0x297   :  { %v2096_v2 = vpop.eup %2095 }
 0x298   :  { %v1330_v3 = vadd.f32 1.0, %v2096_v2 }
 0x299   :  { %v2098_v4 = vpop.eup %2097 }
 0x29a   :  { %2099 = vrcp.f32 %v1330_v3  ;;  %v1331_v5 = vadd.f32 1.0, %v2098_v4 }
 0x29c   :  { %2101 = vrcp.f32 %v1331_v5 }
 0x2a4   :  { %v2100_v10 = vpop.eup %2099 }
 0x2a5   :  { %v1338_v8 = vsub.f32 1.0, %v2100_v10  ;;  %v1336_v14 = vmul.f32 %v2100_v10, %v1099_v24  ;;  %v2093_v24 = vld [vmem:[#allocation8 + $0x130] sm:$0xff]  }
 0x2a6   :  { %v2102_v12 = vpop.eup %2101 }
 0x2a7   :  { %v1339_v15 = vsub.f32 1.0, %v2102_v12  ;;  %v1340_v16 = vmul.f32 %v1338_v8, %v1322_v11  ;;  %v1337_v17 = vmul.f32 %v2102_v12, %v1100_v33  ;;  %v2094_v33 = vld [vmem:[#allocation8 + $0x138] sm:$0xff]  }
 0x2a9   :  { %v1341_v18 = vmul.f32 %v1339_v15, %v1323_v13  ;;  %v1342_v19 = vadd.f32 %v1340_v16, %v1336_v14 }
 0x2ab   :  { %v1343_v20 = vadd.f32 %v1341_v18, %v1337_v17 }
 0x2ad   :  { %v1344_v21 = vpack.c.bf16 %v1343_v20, %v1342_v19 }
 0x2af   :  { %1996 = vmatmul.mubr.bf16.vlgmr.msra.gmra.mrb[12].mxu0 %v1344_v21  ;;  %2016 = vmatmul.mubr.bf16.vlgmr.msra.gmra.mrb[12].mxu1 %v1344_v21 }
 0x2b0   :  { %2035 = vmatprep.mubr.msk.bf16.mxu0 %vm2240_vm0, %v2239_v6  ;;  %2020 = vmatpush3.bf16.msra.mxu0 %v2087_v23 }
 0x2b1   :  { %2021 = vmatprep.subr.bf16.mxu0 %v2239_v6 }
 0x2b4   :  { %2022 = vmatpush3.bf16.msra.mxu0 %v2088_v28 }
 0x2b5   :  { %2023 = vmatprep.subr.bf16.mxu0 %v2239_v6 }
 0x2b8   :  { %2024 = vmatpush3.bf16.msra.mxu0 %v2089_v29 }
 0x2b9   :  { %2025 = vmatprep.subr.bf16.mxu0 %v2239_v6 }
 0x2bc   :  { %2026 = vmatpush3.bf16.msra.mxu0 %v2090_v30 }
 0x2bd   :  { %2027 = vmatprep.subr.bf16.mxu0 %v2239_v6 }
 0x2c0   :  { %2028 = vmatpush3.bf16.msra.mxu0 %v2091_v31 }
 0x2c1   :  { %2029 = vmatprep.subr.bf16.mxu0 %v2239_v6 }
 0x2c4   :  { %2030 = vmatpush3.bf16.msra.mxu0 %v2092_v32 }
 0x2c5   :  { %2031 = vmatprep.subr.bf16.mxu0 %v2239_v6 }
 0x2c8   :  { %2032 = vmatpush3.bf16.msra.mxu0 %v2093_v24 }
 0x2c9   :  { %2033 = vmatprep.subr.bf16.mxu0 %v2239_v6 }
 0x2cc   :  { %2034 = vmatpush3.bf16.msra.mxu0 %v2094_v33 }
 0x382   :  { %v1448_v35 = vpop.f32.mrb[12].mxu0  ;;  %v1558_v36 = vpop.f32.mrb[12].mxu1 }
 0x383   :  { %v1559_v37 = vadd.f32 %v1558_v36, %v1475_v34  ;;  %v1997_v38 = vpop.f32.mrb[13].mxu0  ;;  %v2017_v39 = vpop.f32.mrb[13].mxu1  ;;  %v1449_v49 = vadd.f32 %v1448_v35, %v1365_v27 }
 0x384   :  { %v1451_v56 = vpop.f32.mrb[14].mxu0  ;;  %v1561_v40 = vpop.f32.mrb[14].mxu1 }
 0x385   :  { %v1884_v41 = vmul.f32 -1.442695, %v1559_v37  ;;  %v1562_v42 = vadd.f32 %v1561_v40, %v1475_v34  ;;  %v1998_v43 = vpop.f32.mrb[15].mxu0  ;;  %v2018_v44 = vpop.f32.mrb[15].mxu1  ;;  %v1452_v51 = vadd.f32 %v1451_v56, %v1365_v27  ;;  %v1565_v54 = vmax.f32 %v1449_v49, 0.0 }
 0x387   :  { %2103 = vpow2.f32 %v1884_v41  ;;  %v1885_v45 = vmul.f32 -1.442695, %v1562_v42  ;;  %v1566_v58 = vmax.f32 %v1452_v51, 0.0 }
 0x389   :  { %2105 = vpow2.f32 %v1885_v45 }
 0x391   :  { %v2104_v6 = vpop.eup %2103 }
 0x392   :  { %v1573_v46 = vadd.f32 1.0, %v2104_v6 }
 0x393   :  { %v2106_v47 = vpop.eup %2105 }
 0x394   :  { %2107 = vrcp.f32 %v1573_v46  ;;  %v1574_v48 = vadd.f32 1.0, %v2106_v47 }
 0x396   :  { %2109 = vrcp.f32 %v1574_v48 }
 0x39e   :  { %v2108_v52 = vpop.eup %2107 }
 0x39f   :  { %v1581_v55 = vsub.f32 1.0, %v2108_v52  ;;  %v1579_v59 = vmul.f32 %v2108_v52, %v1342_v19 }
 0x3a0   :  { %v2110_v57 = vpop.eup %2109 }
 0x3a1   :  { %v1582_v60 = vsub.f32 1.0, %v2110_v57  ;;  %v1583_v61 = vmul.f32 %v1581_v55, %v1565_v54  ;;  %v1580_v62 = vmul.f32 %v2110_v57, %v1343_v20 }
 0x3a3   :  { %v1584_v63 = vmul.f32 %v1582_v60, %v1566_v58  ;;  %v1585_v0 = vadd.f32 %v1583_v61, %v1579_v59 }
 0x3a5   :  { %v1586_v1 = vadd.f32 %v1584_v63, %v1580_v62 }
 0x3a7   :  { %v1587_v2 = vpack.c.bf16 %v1586_v1, %v1585_v0 }
 0x3a9   :  { %2036 = vmatmul.mubr.bf16.vlgmr.msra.gmra.mrb[16].mxu0 %v1587_v2 }
 0x47c   :  { %v1691_v3 = vpop.f32.mrb[16].mxu0 }
 0x47d   :  { %v1692_v4 = vadd.f32 %v1691_v3, %v1608_v26  ;;  %v2037_v5 = vpop.f32.mrb[17].mxu0 }
 0x47e   :  { %v1694_v25 = vpop.f32.mrb[18].mxu0 }
 0x47f   :  { %v1695_v7 = vadd.f32 %v1694_v25, %v1608_v26  ;;  %v2038_v9 = vpop.f32.mrb[19].mxu0  ;;  %1699 = vst.msk [vmem:[#allocation10] sm:$0xff] %vm1698_vm1, %v1692_v4 }
 0x481   :  { %1700 = vst.msk [vmem:[#allocation10 + $0x8] sm:$0xff] %vm1698_vm1, %v1695_v7 }
 0x482   :  { %2210 = shalt.err (!%p2207_p8)
}
 0x483   :  { %s2211_s25 = scalar_lea.hbm %s2470_s5, 256 }
 0x484   :  { %p2212_p9 = scmp.ne.s32.totalorder %s2470_s5, %s2211_s25  ;;  %p2215_p10 = scmp.lt.u32.totalorder %s2211_s25, %s2470_s5 }
 0x486   :  { %p2217_p11 = pnand %p2215_p10, %p2212_p9 }
 0x488   :  { %2220 = shalt.err (!%p2217_p11)
}
 0x489   :  { %1712 = dma.vmem_to_hbm [thread:$0]  %s1707_s21, 256, %s2470_s5, [#allocation4], %s2233_s1, %s2233_s1, %s2234_s17  }
 0x48a   :  { %2227 = dma.done.wait [#allocation4], 256  }
 0x48b   :  { %2228 = vsyncadd [#allocation4], 4294967040 }
 0x48c   :  { %1716 = vsyncpa [#allocation3], 1 }
 0x48d   :  { %1717 = vsyncpa [#allocation6], 1 }
 0x48e   :  { %1718 = vsyncpa [#allocation9], 1 }
 0x48f   :  { %1719 = vsyncpa [#allocation4], 1 }

</bundles_post_ra>
